<compile_context>
chip_gen: v5e
topology: v5e:2x2
jax: 0.10.0
libtpu: 0.0.40
codegen_flags: <defaults>
</compile_context>

<pallas_src>
import numpy as np
import jax
import jax.numpy as jnp
from jax.experimental import pallas as pl
from jax.experimental.pallas import tpu as pltpu


def _round_up(n, m):
    return (n + m - 1) // m * m


def _leaky_relu(x, slope=0.2):
    # slope < 1 so max(x, slope*x) == LeakyReLU(x); mul+max instead of cmp+select.
    return jnp.maximum(x, slope * x)


def _mlp_kernel(x_ref, t_ref, w1_ref, w2_ref, b2_ref, w3_ref, b3_ref,
                w4_ref, b4_ref, out_ref):
    # x_ref : (TB, d_img) f32   — flattened image tile (bf16 cast fused in-kernel)
    # t_ref : (TB, H)     bf16  — per-row label term  T[labels] = emb @ W1_lab + b1
    # w*    : bf16 weights (VMEM-resident), b2/b3/w4/b4 f32 (VMEM-resident)
    # out   : (TB, 1)     f32
    x = x_ref[...].astype(jnp.bfloat16)

    h = jnp.dot(x, w1_ref[...], preferred_element_type=jnp.float32) + t_ref[...]
    h = _leaky_relu(h)

    h = jnp.dot(h.astype(jnp.bfloat16), w2_ref[...],
                preferred_element_type=jnp.float32) + b2_ref[...]
    # TODO(synk): nn.Dropout(0.4) is identity in eval mode; training-mode dropout
    # (pltpu.prng_seed / prng_random_bits masking) is omitted.
    h = _leaky_relu(h)

    h = jnp.dot(h.astype(jnp.bfloat16), w3_ref[...],
                preferred_element_type=jnp.float32) + b3_ref[...]
    h = _leaky_relu(h)

    # Final (512 -> 1) layer on VPU/XLU: broadcast-mul + lane reduction, narrow output.
    out_ref[...] = jnp.sum(h * w4_ref[...], axis=-1, keepdims=True) + b4_ref[...]


def init_params(key, img_shape, nb_classes, hidden=512):
    """f32 parameters mirroring the PyTorch module's init."""
    d_in = nb_classes + int(np.prod(img_shape))
    ks = jax.random.split(key, 9)
    emb = jax.random.normal(ks[0], (nb_classes, nb_classes), jnp.float32)

    def linear(kw, kb, fan_in, fan_out):
        bound = 1.0 / np.sqrt(fan_in)
        w = jax.random.uniform(kw, (fan_in, fan_out), jnp.float32, -bound, bound)
        b = jax.random.uniform(kb, (1, fan_out), jnp.float32, -bound, bound)
        return w, b

    l1 = linear(ks[1], ks[2], d_in, hidden)
    l2 = linear(ks[3], ks[4], hidden, hidden)
    l3 = linear(ks[5], ks[6], hidden, hidden)
    l4 = linear(ks[7], ks[8], hidden, 1)
    return emb, l1, l2, l3, l4


def prepare_params(params):
    """One-time preprocessing (NOT per forward call):
       * split W1 into its image rows (K = prod(img_shape), no zero-pad needed) and
         fold the label-embedding rows + b1 into a per-class bias table T,
       * cast weights to bf16, transpose W4 to a (1, hidden) row for the VPU path."""
    emb, (w1, b1), (w2, b2), (w3, b3), (w4, b4) = params
    nb_classes = emb.shape[0]
    d_img = w1.shape[0] - nb_classes
    hidden = w1.shape[1]

    w1_img = w1[:d_img].astype(jnp.bfloat16)                        # (d_img, H)
    t_table = (emb @ w1[d_img:] + b1).astype(jnp.bfloat16)          # (nb_classes, H)

    return dict(
        t_table=t_table,
        w1=w1_img,
        w2=w2.astype(jnp.bfloat16), b2=b2,
        w3=w3.astype(jnp.bfloat16), b3=b3,
        w4=w4.T,                     # (1, hidden) f32 — used on the VPU, keep f32
        b4=b4,                       # (1, 1) f32
        d_img=d_img, hidden=hidden, nb_classes=nb_classes,
    )


def discriminator_forward(img, labels, prep, tb=None):
    """img: (B, C, H, W) f32 (NCHW like PyTorch); labels: (B,) int32."""
    B = img.shape[0]
    d_img, hidden = prep["d_img"], prep["hidden"]

    # Glue kept in JAX (tiny): flatten is a free contiguous view; the label term is a
    # (B, hidden) bf16 gather from the folded table.  No concat, no K zero-pad, no
    # wrapper-side bf16 cast of the image (the f32 image tile is cast inside the kernel).
    flat = img.reshape(B, d_img)
    t = prep["t_table"][labels]
    # TODO(synk): for very large B the (B, hidden) gather could be avoided by passing
    # `labels` via PrefetchScalarGridSpec and gathering a VMEM-resident table in-kernel.

    if tb is None:
        # Use >=2 tiles whenever possible so the "parallel" batch axis shards across
        # both TensorCores on v7x; cap at 512 rows per tile (amortizes per-step overhead,
        # footprint stays a few MiB — well under v7x's 64 MiB VMEM).
        tb = min(512, max(8, _round_up((B + 1) // 2, 8)))
    b_pad = _round_up(B, tb)
    if b_pad != B:
        flat = jnp.pad(flat, ((0, b_pad - B), (0, 0)))
        t = jnp.pad(t, ((0, b_pad - B), (0, 0)))
    num_tiles = b_pad // tb

    resident = lambda shape: pl.BlockSpec(shape, lambda i: (0, 0))   # VMEM-resident
    tiled = lambda feat: pl.BlockSpec((tb, feat), lambda i: (i, 0))  # batch-tiled

    flops = 2 * b_pad * (d_img * hidden + 2 * hidden * hidden + hidden)
    bytes_accessed = (b_pad * d_img * 4 + b_pad * hidden * 2 + b_pad * 4   # x, t, out
                      + d_img * hidden * 2 + 2 * hidden * hidden * 2       # bf16 weights
                      + 2 * hidden * 4 + hidden * 4 + 4)                   # f32 biases/w4

    out_padded = pl.pallas_call(
        _mlp_kernel,
        out_shape=jax.ShapeDtypeStruct((b_pad, 1), jnp.float32),
        grid=(num_tiles,),
        in_specs=[
            tiled(d_img),                    # image tile, f32
            tiled(hidden),                   # per-row label/bias term, bf16
            resident((d_img, hidden)),
            resident((hidden, hidden)), resident((1, hidden)),
            resident((hidden, hidden)), resident((1, hidden)),
            resident((1, hidden)),      resident((1, 1)),
        ],
        out_specs=pl.BlockSpec((tb, 1), lambda i: (i, 0)),
        compiler_params=pltpu.CompilerParams(
            dimension_semantics=("parallel",),     # independent batch tiles -> megacore
            vmem_limit_bytes=32 << 20,
        ),
        cost_estimate=pl.CostEstimate(
            flops=int(flops), transcendentals=0, bytes_accessed=int(bytes_accessed)),
    )(flat, t, prep["w1"], prep["w2"], prep["b2"],
      prep["w3"], prep["b3"], prep["w4"], prep["b4"])

    return out_padded[:B]                          # (B, 1) validity


def reference_forward(img, labels, params):
    """Pure f32 JAX reference matching the PyTorch module (eval mode)."""
    emb, (w1, b1), (w2, b2), (w3, b3), (w4, b4) = params
    B = img.shape[0]
    x = jnp.concatenate([img.reshape(B, -1), emb[labels]], axis=-1)
    lrelu = lambda v: jnp.where(v > 0, v, 0.2 * v)
    h = lrelu(x @ w1 + b1)
    h = lrelu(h @ w2 + b2)
    h = lrelu(h @ w3 + b3)
    return h @ w4 + b4


if __name__ == "__main__":
    IMG_SHAPE = (1, 16, 16)   # (C, H, W) — small shapes consistent with the module
    NB_CLASSES = 10
    BATCH = 16

    key = jax.random.PRNGKey(0)
    k_img, k_lab, k_par = jax.random.split(key, 3)

    img = jax.random.normal(k_img, (BATCH,) + IMG_SHAPE, jnp.float32)
    labels = jax.random.randint(k_lab, (BATCH,), 0, NB_CLASSES, jnp.int32)
    params = init_params(k_par, IMG_SHAPE, NB_CLASSES)
    prep = prepare_params(params)      # one-time split/fold + bf16 cast

    out = discriminator_forward(img, labels, prep)
    out = jax.block_until_ready(out)

    ref = reference_forward(img, labels, params)
    # bf16 matmul inputs (f32 accumulation) -> loosened tolerance vs f32 reference.
    np.testing.assert_allclose(np.asarray(out), np.asarray(ref), rtol=2e-2, atol=2e-2)

    assert out.shape == (BATCH, 1)
    print("KERNEL_OK")
</pallas_src>

<mosaic_0001>
module attributes {stable_mosaic.version = 11 : i64} {
  func.func @_mlp_kernel(%arg0: i32, %arg1: memref<8x256xf32, #tpu.memory_space<vmem>>, %arg2: memref<8x512xbf16, #tpu.memory_space<vmem>>, %arg3: memref<256x512xbf16, #tpu.memory_space<vmem>>, %arg4: memref<512x512xbf16, #tpu.memory_space<vmem>>, %arg5: memref<1x512xf32, #tpu.memory_space<vmem>>, %arg6: memref<512x512xbf16, #tpu.memory_space<vmem>>, %arg7: memref<1x512xf32, #tpu.memory_space<vmem>>, %arg8: memref<1x512xf32, #tpu.memory_space<vmem>>, %arg9: memref<1x1xf32, #tpu.memory_space<vmem>>, %arg10: memref<8x1xf32, #tpu.memory_space<vmem>>) attributes {dimension_semantics = [#tpu.dimension_semantics<parallel>], iteration_bounds = array<i64: 2>, scalar_prefetch = 0 : i64, scratch_operands = 0 : i64, tpu.core_type = #tpu.core_type<tc>, window_params = [{transform_indices = @transform_0, window_bounds = array<i64: 8, 256>}, {transform_indices = @transform_1, window_bounds = array<i64: 8, 512>}, {pipeline_mode = #tpu.pipeline_mode<synchronous>, transform_indices = @transform_2, window_bounds = array<i64: 256, 512>}, {pipeline_mode = #tpu.pipeline_mode<synchronous>, transform_indices = @transform_3, window_bounds = array<i64: 512, 512>}, {pipeline_mode = #tpu.pipeline_mode<synchronous>, transform_indices = @transform_4, window_bounds = array<i64: 1, 512>}, {pipeline_mode = #tpu.pipeline_mode<synchronous>, transform_indices = @transform_5, window_bounds = array<i64: 512, 512>}, {pipeline_mode = #tpu.pipeline_mode<synchronous>, transform_indices = @transform_6, window_bounds = array<i64: 1, 512>}, {pipeline_mode = #tpu.pipeline_mode<synchronous>, transform_indices = @transform_7, window_bounds = array<i64: 1, 512>}, {pipeline_mode = #tpu.pipeline_mode<synchronous>, transform_indices = @transform_8, window_bounds = array<i64: 1, 1>}, {transform_indices = @transform_9, window_bounds = array<i64: 8, 1>}]} {
    %c0 = arith.constant 0 : index
    %c0_0 = arith.constant 0 : index
    %0 = vector.load %arg1[%c0, %c0_0] : memref<8x256xf32, #tpu.memory_space<vmem>>, vector<8x256xf32>
    %1 = arith.truncf %0 : vector<8x256xf32> to vector<8x256xbf16>
    %c0_1 = arith.constant 0 : index
    %c0_2 = arith.constant 0 : index
    %2 = vector.load %arg3[%c0_1, %c0_2] : memref<256x512xbf16, #tpu.memory_space<vmem>>, vector<256x512xbf16>
    %cst = arith.constant dense<0.000000e+00> : vector<8x512xf32>
    %3 = tpu.matmul %1, %2, %cst {dimension_numbers = #tpu.dot_dimension_numbers<[1], [0], [0], [1], [0, 0, 1, 1], [], []>} : vector<8x256xbf16>, vector<256x512xbf16>, vector<8x512xf32> -> vector<8x512xf32>
    %c0_3 = arith.constant 0 : index
    %c0_4 = arith.constant 0 : index
    %4 = vector.load %arg2[%c0_3, %c0_4] : memref<8x512xbf16, #tpu.memory_space<vmem>>, vector<8x512xbf16>
    %5 = arith.extf %4 : vector<8x512xbf16> to vector<8x512xf32>
    %6 = arith.addf %3, %5 : vector<8x512xf32>
    %cst_5 = arith.constant 2.000000e-01 : f32
    %7 = vector.broadcast %cst_5 : f32 to vector<8x512xf32>
    %8 = arith.mulf %7, %6 : vector<8x512xf32>
    %9 = arith.maximumf %6, %8 : vector<8x512xf32>
    %10 = arith.truncf %9 : vector<8x512xf32> to vector<8x512xbf16>
    %c0_6 = arith.constant 0 : index
    %c0_7 = arith.constant 0 : index
    %11 = vector.load %arg4[%c0_6, %c0_7] : memref<512x512xbf16, #tpu.memory_space<vmem>>, vector<512x512xbf16>
    %cst_8 = arith.constant dense<0.000000e+00> : vector<8x512xf32>
    %12 = tpu.matmul %10, %11, %cst_8 {dimension_numbers = #tpu.dot_dimension_numbers<[1], [0], [0], [1], [0, 0, 1, 1], [], []>} : vector<8x512xbf16>, vector<512x512xbf16>, vector<8x512xf32> -> vector<8x512xf32>
    %c0_9 = arith.constant 0 : index
    %c0_10 = arith.constant 0 : index
    %13 = vector.load %arg5[%c0_9, %c0_10] : memref<1x512xf32, #tpu.memory_space<vmem>>, vector<1x512xf32>
    %14 = vector.broadcast %13 : vector<1x512xf32> to vector<8x512xf32>
    %15 = arith.addf %12, %14 : vector<8x512xf32>
    %cst_11 = arith.constant 2.000000e-01 : f32
    %16 = vector.broadcast %cst_11 : f32 to vector<8x512xf32>
    %17 = arith.mulf %16, %15 : vector<8x512xf32>
    %18 = arith.maximumf %15, %17 : vector<8x512xf32>
    %19 = arith.truncf %18 : vector<8x512xf32> to vector<8x512xbf16>
    %c0_12 = arith.constant 0 : index
    %c0_13 = arith.constant 0 : index
    %20 = vector.load %arg6[%c0_12, %c0_13] : memref<512x512xbf16, #tpu.memory_space<vmem>>, vector<512x512xbf16>
    %cst_14 = arith.constant dense<0.000000e+00> : vector<8x512xf32>
    %21 = tpu.matmul %19, %20, %cst_14 {dimension_numbers = #tpu.dot_dimension_numbers<[1], [0], [0], [1], [0, 0, 1, 1], [], []>} : vector<8x512xbf16>, vector<512x512xbf16>, vector<8x512xf32> -> vector<8x512xf32>
    %c0_15 = arith.constant 0 : index
    %c0_16 = arith.constant 0 : index
    %22 = vector.load %arg7[%c0_15, %c0_16] : memref<1x512xf32, #tpu.memory_space<vmem>>, vector<1x512xf32>
    %23 = vector.broadcast %22 : vector<1x512xf32> to vector<8x512xf32>
    %24 = arith.addf %21, %23 : vector<8x512xf32>
    %cst_17 = arith.constant 2.000000e-01 : f32
    %25 = vector.broadcast %cst_17 : f32 to vector<8x512xf32>
    %26 = arith.mulf %25, %24 : vector<8x512xf32>
    %27 = arith.maximumf %24, %26 : vector<8x512xf32>
    %c0_18 = arith.constant 0 : index
    %c0_19 = arith.constant 0 : index
    %28 = vector.load %arg8[%c0_18, %c0_19] : memref<1x512xf32, #tpu.memory_space<vmem>>, vector<1x512xf32>
    %29 = vector.broadcast %28 : vector<1x512xf32> to vector<8x512xf32>
    %30 = arith.mulf %27, %29 : vector<8x512xf32>
    %cst_20 = arith.constant dense<0.000000e+00> : vector<8xf32>
    %31 = vector.multi_reduction <add>, %30, %cst_20 [1] : vector<8x512xf32> to vector<8xf32>
    %32 = vector.shape_cast %31 : vector<8xf32> to vector<8x1xf32>
    %c0_21 = arith.constant 0 : index
    %c0_22 = arith.constant 0 : index
    %33 = vector.load %arg9[%c0_21, %c0_22] : memref<1x1xf32, #tpu.memory_space<vmem>>, vector<1x1xf32>
    %34 = vector.broadcast %33 : vector<1x1xf32> to vector<8x1xf32>
    %35 = arith.addf %32, %34 : vector<8x1xf32>
    %c0_23 = arith.constant 0 : index
    %c0_24 = arith.constant 0 : index
    %36 = vector.load %arg10[%c0_23, %c0_24] : memref<8x1xf32, #tpu.memory_space<vmem>>, vector<8x1xf32>
    tpu.vector_store %arg10[%c0_23, %c0_24], %35 {strides = array<i32>} : memref<8x1xf32, #tpu.memory_space<vmem>>, vector<8x1xf32>,
    return
  }
  func.func @transform_0(%arg0: i32) -> (i32, i32) {
    %c0_i32 = arith.constant 0 : i32
    %c0_i32_0 = arith.constant 0 : i32
    return %arg0, %c0_i32 : i32, i32
  }
  func.func @transform_1(%arg0: i32) -> (i32, i32) {
    %c0_i32 = arith.constant 0 : i32
    %c0_i32_0 = arith.constant 0 : i32
    return %arg0, %c0_i32 : i32, i32
  }
  func.func @transform_2(%arg0: i32) -> (i32, i32) {
    %c0_i32 = arith.constant 0 : i32
    %c0_i32_0 = arith.constant 0 : i32
    %c0_i32_1 = arith.constant 0 : i32
    return %c0_i32, %c0_i32_0 : i32, i32
  }
  func.func @transform_3(%arg0: i32) -> (i32, i32) {
    %c0_i32 = arith.constant 0 : i32
    %c0_i32_0 = arith.constant 0 : i32
    %c0_i32_1 = arith.constant 0 : i32
    return %c0_i32, %c0_i32_0 : i32, i32
  }
  func.func @transform_4(%arg0: i32) -> (i32, i32) {
    %c0_i32 = arith.constant 0 : i32
    %c0_i32_0 = arith.constant 0 : i32
    %c0_i32_1 = arith.constant 0 : i32
    return %c0_i32, %c0_i32_0 : i32, i32
  }
  func.func @transform_5(%arg0: i32) -> (i32, i32) {
    %c0_i32 = arith.constant 0 : i32
    %c0_i32_0 = arith.constant 0 : i32
    %c0_i32_1 = arith.constant 0 : i32
    return %c0_i32, %c0_i32_0 : i32, i32
  }
  func.func @transform_6(%arg0: i32) -> (i32, i32) {
    %c0_i32 = arith.constant 0 : i32
    %c0_i32_0 = arith.constant 0 : i32
    %c0_i32_1 = arith.constant 0 : i32
    return %c0_i32, %c0_i32_0 : i32, i32
  }
  func.func @transform_7(%arg0: i32) -> (i32, i32) {
    %c0_i32 = arith.constant 0 : i32
    %c0_i32_0 = arith.constant 0 : i32
    %c0_i32_1 = arith.constant 0 : i32
    return %c0_i32, %c0_i32_0 : i32, i32
  }
  func.func @transform_8(%arg0: i32) -> (i32, i32) {
    %c0_i32 = arith.constant 0 : i32
    %c0_i32_0 = arith.constant 0 : i32
    %c0_i32_1 = arith.constant 0 : i32
    return %c0_i32, %c0_i32_0 : i32, i32
  }
  func.func @transform_9(%arg0: i32) -> (i32, i32) {
    %c0_i32 = arith.constant 0 : i32
    %c0_i32_0 = arith.constant 0 : i32
    return %arg0, %c0_i32 : i32, i32
  }
}

</mosaic_0001>

<bundles_post_ra>
// kernel: tpu_custom_call.1
= control target key start
LH: loop header
LB: loop body
LE: loop exit
PB: predicated region body
PF: predicated region fallthrough
CT: control target
= control target key end

     0   :  { %s5383_s0 = inlined_call_operand.hbm [shape: f32[16,256], index: 0, kind: input, shape index: {}]   ;;  %s5384_s1 = inlined_call_operand.hbm [shape: bf16[16,512], index: 1, kind: input, shape index: {}]   ;;  %s5385_s2 = inlined_call_operand.hbm [shape: bf16[256,512], index: 2, kind: input, shape index: {}]   ;;  %s5386_s3 = inlined_call_operand.hbm [shape: bf16[512,512], index: 3, kind: input, shape index: {}]   ;;  %s5387_s4 = inlined_call_operand.vmem [shape: f32[1,512], index: 4, kind: input, shape index: {}]   ;;  %s5388_s5 = inlined_call_operand.hbm [shape: bf16[512,512], index: 5, kind: input, shape index: {}]   ;;  %s5389_s6 = inlined_call_operand.hbm [shape: f32[1,512], index: 6, kind: input, shape index: {}]   ;;  %s5390_s7 = inlined_call_operand.vmem [shape: f32[1,512], index: 7, kind: input, shape index: {}]   ;;  %s5391_s8 = inlined_call_operand.<no memory space> [shape: f32[1,1], index: 8, kind: input, shape index: {}]   ;;  %s5392_s9 = inlined_call_operand.vmem [shape: f32[16,1], index: 9, kind: output, shape index: {}]  }
   0x1   :  { %5393 = sst [smem:[#allocation18_spill]] %s5385_s2  ;;  %v14_v0 = vstv %s5391_s8 }
   0x2   :  { %5394 = sst [smem:[#allocation19_spill]] %s5386_s3  ;;  %15 = vst [vmem:[#allocation2] sm:$0x1] %v14_v0 }
   0x3   :  { %5395 = sst [smem:[#allocation20_spill]] %s5388_s5 }
   0x4   :  { %16 = vsyncpa [#allocation4], 0 }
   0x5   :  { %18 = vsyncpa [#allocation4 + $0x1], 0 }
   0x6   :  { %19 = vsyncpa [#allocation6], 0 }
   0x7   :  { %21 = vsyncpa [#allocation6 + $0x1], 0 }
   0x8   :  { %22 = vsyncpa [#allocation9], 0 }
   0x9   :  { %23 = vsyncpa [#allocation12], 0  ;;  %s5115_s11 = smov 0   ;;  %s5117_s12 = smov 0  }
   0xa   :  { %s5119_s13 = smov 0   ;;  %s5121_s14 = smov 0  }
   0xb LB: > { %s5396_s2 = sld [smem:[#allocation18_spill]]  ;;  %s5139_s17 = sadd.s32 4294967295, %s5054_s14   ;;  %s5054_s14 = sphi %s5121_s14, %s5406_s14   ;;  %s5050_s13 = sphi %s5119_s13, %s5405_s13   ;;  %s5046_s12 = sphi %s5117_s12, %s5404_s12   ;;  %s5042_s11 = sphi %s5115_s11, %s5403_s11  }
   0xc   : > { %p3112_p0 = scmp.ge.s32.totalorder %s5054_s14, 1  ;;  %p50_p1 = scmp.eq.s32.totalorder %s5139_s17, 0 }
   0xd   : > { %p259_p2 = scmp.lt.s32.totalorder %s5054_s14, 3  ;;  %s5056_s19 = smov [#allocation7]  }
   0xe   : > { %s272_s20 = sshll.u32 %s5056_s19, 4  ;;  %s5398_s3 = sld [smem:[#allocation19_spill]]  ;;  %s273_s20 = int_to_ptr.vmem [resolvable:$true] %s272_s20 }
   0xf   : > { %p5144_p3 = pnand %p3112_p0, %p259_p2  ;;  %s5400_s5 = sld [smem:[#allocation20_spill]] }
  0x10   : > { %s5057_s28 = smov [#allocation8]   ;;  %s5058_s30 = smov 256  }
  0x11   : > { %s270_s16 = sshll.u32 %s5396_s2, 4  ;;  %p4756_p4 = pneg %p5144_p3  ;;  %s271_s16 = int_to_ptr.hbm [resolvable:$true] %s270_s16 }
  0x12   : > { %s286_s29 = sshll.u32 %s5057_s28, 4  ;;  %s5059_s10 = smov 16   ;;  %s287_s29 = int_to_ptr.vmem [resolvable:$true] %s286_s29 }
  0x13   : > { %p5155_p5 = pnand %p4756_p4, %p50_p1  ;;  %s316_s19 = sshll.u32 %s5389_s6, 4  ;;  %s317_s19 = int_to_ptr.hbm [resolvable:$true] %s316_s19 }
  0x14   : > { %s284_s23 = sshll.u32 %s5398_s3, 4  ;;  %s5060_s21 = smov [#allocation10]   ;;  %s285_s23 = int_to_ptr.hbm [resolvable:$true] %s284_s23 }
  0x15   : > { %s301_s27 = sshll.u32 %s5400_s5, 4  ;;  %s303_s22 = sshll.u32 %s5060_s21, 4  ;;  %s302_s27 = int_to_ptr.hbm [resolvable:$true] %s301_s27  ;;  %s304_s22 = int_to_ptr.vmem [resolvable:$true] %s303_s22 }
  0x16   : > { %4759 = dma.hbm_to_vmem [thread:$0]  (!%p5155_p5), %s271_s16, 8192, %s273_s20, [#allocation6], %s5058_s30, %s5058_s30, %s5059_s10  }
  0x17   : > { %4762 = dma.hbm_to_vmem [thread:$0]  (!%p5155_p5), %s285_s23, 16384, %s287_s29, [#allocation9], %s5058_s30, %s5058_s30, %s5059_s10  }
  0x18   : > { %4765 = dma.hbm_to_vmem [thread:$0]  (!%p5155_p5), %s302_s27, 16384, %s304_s22, [#allocation9], %s5058_s30, %s5058_s30, %s5059_s10  }
  0x19   : > { %s5061_s16 = smov [#allocation11]   ;;  %s5174_s23 = sadd.s32 1, %s5054_s14  }
  0x1a   : > { %s318_s20 = sshll.u32 %s5061_s16, 4  ;;  %s36_s25 = sadd.s32 1, %s5050_s13  ;;  %s319_s20 = int_to_ptr.vmem [resolvable:$true] %s318_s20 }
  0x1b   : > { %4768 = dma.hbm_to_vmem [thread:$0]  (!%p5155_p5), %s317_s19, 64, %s319_s20, [#allocation12]  }
  0x1c   : > { %s33_s26 = ssub.s32 %s5054_s14, %s5174_s23  ;;  %p43_p6 = scmp.ne.s32.totalorder %s5050_s13, %s5046_s12 }
  0x1d   : > { %p34_p7 = scmp.eq.s32.totalorder %s33_s26, 0  ;;  %p44_p8 = scmp.eq.s32.totalorder %s5054_s14, 0 }
  0x1e   : > { %p49_p9 = scmp.ne.s32.totalorder %s5046_s12, %s5042_s11  ;;  %p4780_p10 = scmp.lt.s32.totalorder %s5054_s14, 2 }
  0x1f   : > { %s5186_s27 = scalar_select %p34_p7, %s5050_s13, %s36_s25  }
  0x20   : > { %p45_p11 = por %p44_p8, %p43_p6  ;;  %p5190_p12 = por %p50_p1, %p49_p9 }
  0x21   : > { %s335_s24 = sand.u32 1, %s5050_s13   ;;  %s4414_s29 = sshll.u32 %s5054_s14, 4 }
  0x22   : > { %s3118_s30 = sshll.u32 %s335_s24, 4  ;;  %s344_s15 = scalar_lea.hbm %s5383_s0, %s4414_s29 }
  0x23   : > { %s346_s19 = sshll.u32 %s344_s15, 4  ;;  %s339_s21 = scalar_lea.vmem [#allocation3], %s3118_s30  ;;  %s347_s19 = int_to_ptr.hbm [resolvable:$true] %s346_s19 }
  0x24   : > { %s348_s11 = sshll.u32 %s339_s21, 4  ;;  %p5201_p13 = pnand %p4780_p10, %p45_p11  ;;  %s349_s11 = int_to_ptr.vmem [resolvable:$true] %s348_s11 }
  0x25   : > { %s364_s25 = scalar_lea.hbm %s5384_s1, %s4414_s29  ;;  %s355_s26 = sand.u32 1, %s5054_s14  }
  0x26   : > { %s336_s2 = scalar_lea.sflag [#allocation4], %s335_s24  ;;  %s4944_s10 = sshra.s32 %s347_s19, 4  ;;  %s4945_s10 = int_to_ptr.hbm [resolvable:$true] %s4944_s10 }
  0x27   : > { %s4946_s8 = scalar_lea.hbm %s4945_s10, 16  ;;  %p4948_p2 = pneg %p5201_p13 }
  0x28   : > { %p4947_p0 = scmp.ne.s32.totalorder %s4945_s10, %s4946_s8  ;;  %s4951_s3 = scalar_lea.hbm %s5383_s0, 32 }
  0x29   : > { %p4952_p6 = scmp.lt.s32.totalorder %s4945_s10, %s5383_s0  ;;  %p4953_p7 = scmp.lt.s32.totalorder %s4951_s3, %s4946_s8 }
  0x2a   : > { %p4949_p4 = pnand %p4948_p2, %p4947_p0 }
  0x2b   : > { %p4954_p8 = por %p4953_p7, %p4952_p6 }
  0x2c   : > { %p4950_p5 = pneg %p4949_p4 }
  0x2e   : > { %p4955_p9 = pnand %p4954_p8, %p4950_p5 }
  0x30   : > { %4958 = shalt.err (!%p4955_p9)
}
  0x31   : > { %4772 = dma.hbm_to_vmem [thread:$0]  (!%p5201_p13), %s347_s19, 256, %s349_s11, %s336_s2  }
  0x32   : > { %s366_s14 = sshll.u32 %s364_s25, 4  ;;  %s359_s24 = scalar_lea.vmem [#allocation5], %s3118_s30  ;;  %s367_s14 = int_to_ptr.hbm [resolvable:$true] %s366_s14 }
  0x33   : > { %s368_s29 = sshll.u32 %s359_s24, 4  ;;  %s356_s5 = scalar_lea.sflag [#allocation6], %s355_s26  ;;  %s369_s29 = int_to_ptr.vmem [resolvable:$true] %s368_s29 }
  0x34   : > { %s4974_s15 = sshra.s32 %s367_s14, 4  ;;  %s4981_s8 = scalar_lea.hbm %s5384_s1, 32  ;;  %s4975_s15 = int_to_ptr.hbm [resolvable:$true] %s4974_s15 }
  0x35   : > { %s4976_s21 = scalar_lea.hbm %s4975_s15, 16  ;;  %p4982_p4 = scmp.lt.s32.totalorder %s4975_s15, %s5384_s1 }
  0x36   : > { %p4977_p10 = scmp.ne.s32.totalorder %s4975_s15, %s4976_s21  ;;  %p4983_p5 = scmp.lt.s32.totalorder %s4981_s8, %s4976_s21 }
  0x38   : > { %p4979_p11 = pnand %p4977_p10, %p4948_p2  ;;  %p4984_p6 = por %p4983_p5, %p4982_p4 }
  0x3a   : > { %p4980_p0 = pneg %p4979_p11 }
  0x3c   : > { %p4985_p7 = pnand %p4984_p6, %p4980_p0 }
  0x3e   : > { %4988 = shalt.err (!%p4985_p7)
}
  0x3f   : > { %4775 = dma.hbm_to_vmem [thread:$0]  (!%p5201_p13), %s367_s14, 256, %s369_s29, %s356_s5  }
  0x40   : > { %377 = sbr.rel (%p5144_p3) target bundleno = 818 (0x332), region = 56  ;;  %s379_s30 = sand.u32 (!%p5144_p3), 1, %s5046_s12  }
  0x41   : > { %s5236_s19 = sshll.u32 (!%p5144_p3), %s379_s30, 4  ;;  %s380_s11 = scalar_lea.sflag (!%p5144_p3), [#allocation4], %s379_s30 }
  0x42   : > { %s383_s25 = scalar_lea.vmem (!%p5144_p3), [#allocation3], %s5236_s19 }
  0x45   : > { %5021 = dma.done.wait (%p5190_p12), %s380_s11, 256  }
  0x46   : > { %5023 = vsyncadd (%p5190_p12), %s380_s11, 4294967040  ;;  %s389_s5 = sand.u32 1, %s5139_s17   ;;  %s393_s18 = scalar_lea.vmem [#allocation5], %s5236_s19 }
  0x47   : > { %s390_s22 = scalar_lea.sflag [#allocation6], %s389_s5 }
  0x48   : > { %5025 = dma.done.wait (%p5190_p12), %s390_s22, 256  }
  0x49   : > { %5027 = vsyncadd (%p5190_p12), %s390_s22, 4294967040 }
  0x4a   : > { %5029 = dma.done.wait (%p50_p1), [#allocation6], 8192  }
  0x4b   : > { %5031 = vsyncadd (%p50_p1), [#allocation6], 4294959104 }
  0x4c   : > { %5033 = dma.done.wait (%p50_p1), [#allocation9], 32768  }
  0x4d   : > { %5035 = vsyncadd (%p50_p1), [#allocation9], 4294934528 }
  0x4e   : > { %5037 = dma.done.wait (%p50_p1), [#allocation12], 64  }
  0x4f   : > { %5039 = vsyncadd (%p50_p1), [#allocation12], 4294967232  ;;  %v3246_v1 = vld [vmem:[#allocation7 + $0xe0] sm:$0xf]  ;;  %v4446_v2 = vld [vmem:[#allocation7 + $0xec] sm:$0xf0] }
  0x50   : > { %v3374_v3 = vld [vmem:[#allocation7 + $0x1e0] sm:$0xf]  ;;  %v3247_v4 = vor.u32 %v4446_v2, %v3246_v1  ;;  %v4478_v5 = vld [vmem:[#allocation7 + $0x1ec] sm:$0xf0]  ;;  %v4444_v6 = vld [vmem:[#allocation7 + $0xe4] sm:$0xf] }
  0x51   : > { %v3248_v7 = vld [vmem:[#allocation7 + $0xf0] sm:$0xf0]  ;;  %v3375_v8 = vor.u32 %v4478_v5, %v3374_v3  ;;  %v4476_v10 = vld [vmem:[#allocation7 + $0x1e4] sm:$0xf]  ;;  %v3230_v12 = vld [vmem:[#allocation7 + $0xc0] sm:$0xf] }
  0x52   : > { %v3251_v9 = vor.u32 %v4444_v6, %v3248_v7  ;;  %v3376_v11 = vld [vmem:[#allocation7 + $0x1f0] sm:$0xf0]  ;;  %851 = vmatpush.bf16.msra.mxu0 %v3247_v4  ;;  %v4442_v14 = vld [vmem:[#allocation7 + $0xcc] sm:$0xf0]  ;;  %v3358_v15 = vld [vmem:[#allocation7 + $0x1c0] sm:$0xf] }
  0x53   : > { %v3379_v13 = vor.u32 %v4476_v10, %v3376_v11  ;;  %v4474_v16 = vld [vmem:[#allocation7 + $0x1cc] sm:$0xf0]  ;;  %864 = vmatpush.bf16.msra.mxu1 %v3375_v8  ;;  %v3231_v17 = vor.u32 %v4442_v14, %v3230_v12  ;;  %v4440_v19 = vld [vmem:[#allocation7 + $0xc4] sm:$0xf]  ;;  %v3232_v20 = vld [vmem:[#allocation7 + $0xd0] sm:$0xf0] }
  0x54   : > { %877 = vmatpush.bf16.msra.mxu2 %v3251_v9  ;;  %v3359_v18 = vor.u32 %v4474_v16, %v3358_v15  ;;  %v4472_v21 = vld [vmem:[#allocation7 + $0x1c4] sm:$0xf]  ;;  %v3235_v22 = vor.u32 %v4440_v19, %v3232_v20  ;;  %v3360_v23 = vld [vmem:[#allocation7 + $0x1d0] sm:$0xf0]  ;;  %v3214_v24 = vld [vmem:[#allocation7 + $0xa0] sm:$0xf] }
  0x55   : > { %890 = vmatpush.bf16.msra.mxu3 %v3379_v13  ;;  %v4438_v25 = vld [vmem:[#allocation7 + $0xac] sm:$0xf0]  ;;  %v3363_v26 = vor.u32 %v4472_v21, %v3360_v23  ;;  %v3342_v27 = vld [vmem:[#allocation7 + $0x1a0] sm:$0xf]  ;;  %v4436_v29 = vld [vmem:[#allocation7 + $0xa4] sm:$0xf] }
  0x56   : > { %v4470_v28 = vld [vmem:[#allocation7 + $0x1ac] sm:$0xf0]  ;;  %852 = vmatpush.bf16.msra.mxu0 %v3231_v17  ;;  %v3215_v30 = vor.u32 %v4438_v25, %v3214_v24  ;;  %v3216_v31 = vld [vmem:[#allocation7 + $0xb0] sm:$0xf0]  ;;  %v4468_v32 = vld [vmem:[#allocation7 + $0x1a4] sm:$0xf] }
  0x57   : > { %v3344_v33 = vld [vmem:[#allocation7 + $0x1b0] sm:$0xf0]  ;;  %865 = vmatpush.bf16.msra.mxu1 %v3359_v18  ;;  %v3343_v34 = vor.u32 %v4470_v28, %v3342_v27  ;;  %v3219_v35 = vor.u32 %v4436_v29, %v3216_v31  ;;  %v3198_v36 = vld [vmem:[#allocation7 + $0x80] sm:$0xf]  ;;  %v4434_v37 = vld [vmem:[#allocation7 + $0x8c] sm:$0xf0] }
  0x58   : > { %878 = vmatpush.bf16.msra.mxu2 %v3235_v22  ;;  %v3326_v38 = vld [vmem:[#allocation7 + $0x180] sm:$0xf]  ;;  %v3347_v39 = vor.u32 %v4468_v32, %v3344_v33  ;;  %v4466_v40 = vld [vmem:[#allocation7 + $0x18c] sm:$0xf0]  ;;  %v4432_v41 = vld [vmem:[#allocation7 + $0x84] sm:$0xf]  ;;  %v3199_v45 = vor.u32 %v4434_v37, %v3198_v36 }
  0x59   : > { %891 = vmatpush.bf16.msra.mxu3 %v3363_v26  ;;  %v3200_v42 = vld [vmem:[#allocation7 + $0x90] sm:$0xf0]  ;;  %v4464_v43 = vld [vmem:[#allocation7 + $0x184] sm:$0xf]  ;;  %v3327_v46 = vor.u32 %v4466_v40, %v3326_v38  ;;  %v3182_v48 = vld [vmem:[#allocation7 + $0x60] sm:$0xf] }
  0x5a   : > { %v3328_v44 = vld [vmem:[#allocation7 + $0x190] sm:$0xf0]  ;;  %853 = vmatpush.bf16.msra.mxu0 %v3215_v30  ;;  %v3203_v47 = vor.u32 %v4432_v41, %v3200_v42  ;;  %v4430_v49 = vld [vmem:[#allocation7 + $0x6c] sm:$0xf0]  ;;  %v3310_v50 = vld [vmem:[#allocation7 + $0x160] sm:$0xf] }
  0x5b   : > { %866 = vmatpush.bf16.msra.mxu1 %v3343_v34  ;;  %v3331_v51 = vor.u32 %v4464_v43, %v3328_v44  ;;  %v4462_v52 = vld [vmem:[#allocation7 + $0x16c] sm:$0xf0]  ;;  %v4428_v53 = vld [vmem:[#allocation7 + $0x64] sm:$0xf]  ;;  %v3184_v54 = vld [vmem:[#allocation7 + $0x70] sm:$0xf0]  ;;  %v3183_v57 = vor.u32 %v4430_v49, %v3182_v48 }
  0x5c   : > { %879 = vmatpush.bf16.msra.mxu2 %v3219_v35  ;;  %v4460_v55 = vld [vmem:[#allocation7 + $0x164] sm:$0xf]  ;;  %v3312_v56 = vld [vmem:[#allocation7 + $0x170] sm:$0xf0]  ;;  %v3311_v58 = vor.u32 %v4462_v52, %v3310_v50  ;;  %v3187_v59 = vor.u32 %v4428_v53, %v3184_v54  ;;  %v3166_v60 = vld [vmem:[#allocation7 + $0x40] sm:$0xf] }
  0x5d   : > { %892 = vmatpush.bf16.msra.mxu3 %v3347_v39  ;;  %v4426_v61 = vld [vmem:[#allocation7 + $0x4c] sm:$0xf0]  ;;  %v3294_v62 = vld [vmem:[#allocation7 + $0x140] sm:$0xf]  ;;  %v3315_v63 = vor.u32 %v4460_v55, %v3312_v56  ;;  %v4424_v1 = vld [vmem:[#allocation7 + $0x44] sm:$0xf] }
  0x5e   : > { %854 = vmatpush.bf16.msra.mxu0 %v3199_v45  ;;  %v4458_v0 = vld [vmem:[#allocation7 + $0x14c] sm:$0xf0]  ;;  %v3168_v2 = vld [vmem:[#allocation7 + $0x50] sm:$0xf0]  ;;  %v4456_v3 = vld [vmem:[#allocation7 + $0x144] sm:$0xf]  ;;  %v3167_v5 = vor.u32 %v4426_v61, %v3166_v60 }
  0x5f   : > { %867 = vmatpush.bf16.msra.mxu1 %v3327_v46  ;;  %v3296_v4 = vld [vmem:[#allocation7 + $0x150] sm:$0xf0]  ;;  %v3295_v6 = vor.u32 %v4458_v0, %v3294_v62  ;;  %v3171_v7 = vor.u32 %v4424_v1, %v3168_v2  ;;  %v3150_v8 = vld [vmem:[#allocation7 + $0x20] sm:$0xf]  ;;  %v4422_v9 = vld [vmem:[#allocation7 + $0x2c] sm:$0xf0] }
  0x60   : > { %880 = vmatpush.bf16.msra.mxu2 %v3203_v47  ;;  %v3278_v10 = vld [vmem:[#allocation7 + $0x120] sm:$0xf]  ;;  %v3299_v11 = vor.u32 %v4456_v3, %v3296_v4  ;;  %v4454_v12 = vld [vmem:[#allocation7 + $0x12c] sm:$0xf0]  ;;  %v4420_v13 = vld [vmem:[#allocation7 + $0x24] sm:$0xf]  ;;  %v3151_v17 = vor.u32 %v4422_v9, %v3150_v8 }
  0x61   : > { %893 = vmatpush.bf16.msra.mxu3 %v3331_v51  ;;  %v3152_v14 = vld [vmem:[#allocation7 + $0x30] sm:$0xf0]  ;;  %v4452_v15 = vld [vmem:[#allocation7 + $0x124] sm:$0xf]  ;;  %v3134_v18 = vld [vmem:[#allocation7] sm:$0xf]  ;;  %v3279_v20 = vor.u32 %v4454_v12, %v3278_v10 }
  0x62   : > { %855 = vmatpush.bf16.msra.mxu0 %v3183_v57  ;;  %v3280_v16 = vld [vmem:[#allocation7 + $0x130] sm:$0xf0]  ;;  %v4418_v19 = vld [vmem:[#allocation7 + $0xc] sm:$0xf0]  ;;  %v3155_v21 = vor.u32 %v4420_v13, %v3152_v14  ;;  %v3262_v22 = vld [vmem:[#allocation7 + $0x100] sm:$0xf] }
  0x63   : > { %868 = vmatpush.bf16.msra.mxu1 %v3311_v58  ;;  %v4450_v23 = vld [vmem:[#allocation7 + $0x10c] sm:$0xf0]  ;;  %v4416_v24 = vld [vmem:[#allocation7 + $0x4] sm:$0xf]  ;;  %v3283_v25 = vor.u32 %v4452_v15, %v3280_v16  ;;  %v3136_v26 = vld [vmem:[#allocation7 + $0x10] sm:$0xf0]  ;;  %v3135_v32 = vor.u32 %v4418_v19, %v3134_v18 }
  0x64   : > { %881 = vmatpush.bf16.msra.mxu2 %v3187_v59  ;;  %v4448_v27 = vld [vmem:[#allocation7 + $0x104] sm:$0xf]  ;;  %v3264_v28 = vld [vmem:[#allocation7 + $0x110] sm:$0xf0]  ;;  %v3254_v29 = vld [vmem:[#allocation7 + $0xe8] sm:$0xf]  ;;  %v3263_v36 = vor.u32 %v4450_v23, %v3262_v22  ;;  %v3139_v37 = vor.u32 %v4416_v24, %v3136_v26 }
  0x65   : > { %894 = vmatpush.bf16.msra.mxu3 %v3315_v63  ;;  %v4447_v30 = vld [vmem:[#allocation7 + $0xf4] sm:$0xf0]  ;;  %v3382_v31 = vld [vmem:[#allocation7 + $0x1e8] sm:$0xf]  ;;  %v4445_v34 = vld [vmem:[#allocation7 + $0xec] sm:$0xf]  ;;  %v3267_v41 = vor.u32 %v4448_v27, %v3264_v28 }
  0x66   : > { %856 = vmatpush.bf16.msra.mxu0 %v3167_v5  ;;  %v4479_v33 = vld [vmem:[#allocation7 + $0x1f4] sm:$0xf0]  ;;  %v3256_v35 = vld [vmem:[#allocation7 + $0xf8] sm:$0xf0]  ;;  %v4477_v38 = vld [vmem:[#allocation7 + $0x1ec] sm:$0xf]  ;;  %v3255_v42 = vor.u32 %v4447_v30, %v3254_v29 }
  0x67   : > { %869 = vmatpush.bf16.msra.mxu1 %v3295_v6  ;;  %v3384_v39 = vld [vmem:[#allocation7 + $0x1f8] sm:$0xf0]  ;;  %v457_v40 = vld [vmem:[%s383_s25] sm:$0xff]  ;;  %v3383_v44 = vor.u32 %v4479_v33, %v3382_v31  ;;  %v3259_v45 = vor.u32 %v4445_v34, %v3256_v35  ;;  %v3238_v46 = vld [vmem:[#allocation7 + $0xc8] sm:$0xf]  ;;  %p453_p1 = scmp.lt.s32.totalorder %s5139_s17, 1 }
  0x68   : > { %882 = vmatpush.bf16.msra.mxu2 %v3171_v7  ;;  %v458_v43 = vld [vmem:[%s383_s25 + $0x8] sm:$0xff]  ;;  %v3387_v49 = vor.u32 %v4477_v38, %v3384_v39  ;;  %v5265_v50 = vpack.c.bf16 %v457_v40, %v457_v40  ;;  %vm2983_vm0 = vcmask 7168  }
  0x69   : > { %895 = vmatpush.bf16.msra.mxu3 %v3299_v11  ;;  %v4443_v47 = vld [vmem:[#allocation7 + $0xd4] sm:$0xf0]  ;;  %v3366_v48 = vld [vmem:[#allocation7 + $0x1c8] sm:$0xf]  ;;  %v4441_v52 = vld [vmem:[#allocation7 + $0xcc] sm:$0xf]  ;;  %v5267_v54 = vpack.c.bf16 %v458_v43, %v458_v43 }
  0x6a   : > { %857 = vmatpush.bf16.msra.mxu0 %v3151_v17  ;;  %v4475_v51 = vld [vmem:[#allocation7 + $0x1d4] sm:$0xf0]  ;;  %v3240_v53 = vld [vmem:[#allocation7 + $0xd8] sm:$0xf0]  ;;  %v4473_v55 = vld [vmem:[#allocation7 + $0x1cc] sm:$0xf]  ;;  %v3239_v57 = vor.u32 %v4443_v47, %v3238_v46 }
  0x6b   : > { %870 = vmatpush.bf16.msra.mxu1 %v3279_v20  ;;  %v3368_v56 = vld [vmem:[#allocation7 + $0x1d8] sm:$0xf0]  ;;  %v3367_v58 = vor.u32 %v4475_v51, %v3366_v48  ;;  %v3243_v59 = vor.u32 %v4441_v52, %v3240_v53  ;;  %v3222_v60 = vld [vmem:[#allocation7 + $0xa8] sm:$0xf]  ;;  %v4439_v61 = vld [vmem:[#allocation7 + $0xb4] sm:$0xf0] }
  0x6c   : > { %883 = vmatpush.bf16.msra.mxu2 %v3155_v21  ;;  %v3350_v62 = vld [vmem:[#allocation7 + $0x1a8] sm:$0xf]  ;;  %v3371_v63 = vor.u32 %v4473_v55, %v3368_v56  ;;  %v4471_v0 = vld [vmem:[#allocation7 + $0x1b4] sm:$0xf0]  ;;  %v4437_v1 = vld [vmem:[#allocation7 + $0xac] sm:$0xf]  ;;  %v3223_v5 = vor.u32 %v4439_v61, %v3222_v60 }
  0x6d   : > { %896 = vmatpush.bf16.msra.mxu3 %v3283_v25  ;;  %v3224_v2 = vld [vmem:[#allocation7 + $0xb8] sm:$0xf0]  ;;  %v4469_v3 = vld [vmem:[#allocation7 + $0x1ac] sm:$0xf]  ;;  %v3351_v6 = vor.u32 %v4471_v0, %v3350_v62  ;;  %v3206_v8 = vld [vmem:[#allocation7 + $0x88] sm:$0xf] }
  0x6e   : > { %858 = vmatpush.bf16.msra.mxu0 %v3135_v32  ;;  %v3352_v4 = vld [vmem:[#allocation7 + $0x1b8] sm:$0xf0]  ;;  %v3227_v7 = vor.u32 %v4437_v1, %v3224_v2  ;;  %v4435_v9 = vld [vmem:[#allocation7 + $0x94] sm:$0xf0]  ;;  %v3334_v10 = vld [vmem:[#allocation7 + $0x188] sm:$0xf] }
  0x6f   : > { %871 = vmatpush.bf16.msra.mxu1 %v3263_v36  ;;  %v3355_v11 = vor.u32 %v4469_v3, %v3352_v4  ;;  %v4467_v12 = vld [vmem:[#allocation7 + $0x194] sm:$0xf0]  ;;  %v4433_v13 = vld [vmem:[#allocation7 + $0x8c] sm:$0xf]  ;;  %v3208_v14 = vld [vmem:[#allocation7 + $0x98] sm:$0xf0]  ;;  %v3207_v17 = vor.u32 %v4435_v9, %v3206_v8 }
  0x70   : > { %884 = vmatpush.bf16.msra.mxu2 %v3139_v37  ;;  %v4465_v15 = vld [vmem:[#allocation7 + $0x18c] sm:$0xf]  ;;  %v3336_v16 = vld [vmem:[#allocation7 + $0x198] sm:$0xf0]  ;;  %v3335_v18 = vor.u32 %v4467_v12, %v3334_v10  ;;  %v3211_v19 = vor.u32 %v4433_v13, %v3208_v14  ;;  %v3190_v20 = vld [vmem:[#allocation7 + $0x68] sm:$0xf] }
  0x71   : > { %897 = vmatpush.bf16.msra.mxu3 %v3267_v41  ;;  %859 = vmatmul.bf16.vlgmr.msra.gmra.mxu0 %v5265_v50  ;;  %v4431_v21 = vld [vmem:[#allocation7 + $0x74] sm:$0xf0]  ;;  %v3318_v22 = vld [vmem:[#allocation7 + $0x168] sm:$0xf]  ;;  %v3339_v23 = vor.u32 %v4465_v15, %v3336_v16  ;;  %v4429_v25 = vld [vmem:[#allocation7 + $0x6c] sm:$0xf] }
  0x72   : > { %903 = vmatpush.bf16.msrb.mxu0 %v3255_v42  ;;  %872 = vmatmul.bf16.vlgmr.msra.gmra.mxu1 %v5267_v54  ;;  %v4463_v24 = vld [vmem:[#allocation7 + $0x174] sm:$0xf0]  ;;  %v3192_v26 = vld [vmem:[#allocation7 + $0x78] sm:$0xf0]  ;;  %v4461_v27 = vld [vmem:[#allocation7 + $0x16c] sm:$0xf]  ;;  %v3191_v29 = vor.u32 %v4431_v21, %v3190_v20 }
  0x73   : > { %916 = vmatpush.bf16.msrb.mxu1 %v3383_v44  ;;  %885 = vmatmul.bf16.vlgmr.msra.gmra.mxu2 %v5265_v50  ;;  %v3320_v28 = vld [vmem:[#allocation7 + $0x178] sm:$0xf0]  ;;  %v3319_v30 = vor.u32 %v4463_v24, %v3318_v22  ;;  %v3195_v31 = vor.u32 %v4429_v25, %v3192_v26  ;;  %v3174_v32 = vld [vmem:[#allocation7 + $0x48] sm:$0xf]  ;;  %v4427_v33 = vld [vmem:[#allocation7 + $0x54] sm:$0xf0] }
  0x74   : > { %929 = vmatpush.bf16.msrb.mxu2 %v3259_v45  ;;  %898 = vmatmul.bf16.vlgmr.msra.gmra.mxu3 %v5267_v54  ;;  %v3302_v34 = vld [vmem:[#allocation7 + $0x148] sm:$0xf]  ;;  %v3323_v35 = vor.u32 %v4461_v27, %v3320_v28  ;;  %v4459_v36 = vld [vmem:[#allocation7 + $0x154] sm:$0xf0]  ;;  %v4425_v37 = vld [vmem:[#allocation7 + $0x4c] sm:$0xf]  ;;  %v3175_v41 = vor.u32 %v4427_v33, %v3174_v32 }
  0x75   : > { %942 = vmatpush.bf16.msrb.mxu3 %v3387_v49  ;;  %v3176_v38 = vld [vmem:[#allocation7 + $0x58] sm:$0xf0]  ;;  %v4457_v39 = vld [vmem:[#allocation7 + $0x14c] sm:$0xf]  ;;  %v3158_v42 = vld [vmem:[#allocation7 + $0x28] sm:$0xf]  ;;  %v3303_v43 = vor.u32 %v4459_v36, %v3302_v34 }
  0x76   : > { %904 = vmatpush.bf16.msrb.mxu0 %v3239_v57  ;;  %v3304_v40 = vld [vmem:[#allocation7 + $0x158] sm:$0xf0]  ;;  %v3179_v44 = vor.u32 %v4425_v37, %v3176_v38  ;;  %v4423_v45 = vld [vmem:[#allocation7 + $0x34] sm:$0xf0]  ;;  %v3286_v46 = vld [vmem:[#allocation7 + $0x128] sm:$0xf] }
  0x77   : > { %917 = vmatpush.bf16.msrb.mxu1 %v3367_v58  ;;  %v3307_v47 = vor.u32 %v4457_v39, %v3304_v40  ;;  %v4455_v48 = vld [vmem:[#allocation7 + $0x134] sm:$0xf0]  ;;  %v4421_v49 = vld [vmem:[#allocation7 + $0x2c] sm:$0xf]  ;;  %v3160_v51 = vld [vmem:[#allocation7 + $0x38] sm:$0xf0]  ;;  %v3159_v55 = vor.u32 %v4423_v45, %v3158_v42 }
  0x78   : > { %930 = vmatpush.bf16.msrb.mxu2 %v3243_v59  ;;  %v4453_v52 = vld [vmem:[#allocation7 + $0x12c] sm:$0xf]  ;;  %v3288_v53 = vld [vmem:[#allocation7 + $0x138] sm:$0xf0]  ;;  %v3142_v56 = vld [vmem:[#allocation7 + $0x8] sm:$0xf]  ;;  %v3287_v57 = vor.u32 %v4455_v48, %v3286_v46  ;;  %v3163_v58 = vor.u32 %v4421_v49, %v3160_v51 }
  0x79   : > { %943 = vmatpush.bf16.msrb.mxu3 %v3371_v63  ;;  %v4419_v59 = vld [vmem:[#allocation7 + $0x14] sm:$0xf0]  ;;  %v3270_v60 = vld [vmem:[#allocation7 + $0x108] sm:$0xf]  ;;  %v3291_v62 = vor.u32 %v4453_v52, %v3288_v53  ;;  %v4417_v63 = vld [vmem:[#allocation7 + $0xc] sm:$0xf] }
  0x7a   : > { %905 = vmatpush.bf16.msrb.mxu0 %v3223_v5  ;;  %v4451_v61 = vld [vmem:[#allocation7 + $0x114] sm:$0xf0]  ;;  %v3144_v0 = vld [vmem:[#allocation7 + $0x18] sm:$0xf0]  ;;  %v4449_v1 = vld [vmem:[#allocation7 + $0x10c] sm:$0xf]  ;;  %v3143_v5 = vor.u32 %v4419_v59, %v3142_v56 }
  0x7b   : > { %918 = vmatpush.bf16.msrb.mxu1 %v3351_v6  ;;  %v3272_v2 = vld [vmem:[#allocation7 + $0x118] sm:$0xf0]  ;;  %v3502_v3 = vld [vmem:[#allocation8 + $0xe0] sm:$0xf]  ;;  %v4510_v4 = vld [vmem:[#allocation8 + $0xec] sm:$0xf0]  ;;  %v3271_v8 = vor.u32 %v4451_v61, %v3270_v60  ;;  %v3147_v9 = vor.u32 %v4417_v63, %v3144_v0 }
  0x7c   : > { %931 = vmatpush.bf16.msrb.mxu2 %v3227_v7  ;;  %v3630_v6 = vld [vmem:[#allocation8 + $0x1e0] sm:$0xf]  ;;  %v4542_v7 = vld [vmem:[#allocation8 + $0x1ec] sm:$0xf0]  ;;  %v3275_v10 = vor.u32 %v4449_v1, %v3272_v2  ;;  %s5408_s17 = smov (!%p453_p1, %s5139_s17), 1 }
  0x7d   : > { %944 = vmatpush.bf16.msrb.mxu3 %v3355_v11  ;;  %v3503_v11 = vor.u32 %v4510_v4, %v3502_v3  ;;  %v3758_v12 = vld [vmem:[#allocation8 + $0x2e0] sm:$0xf]  ;;  %v4574_v13 = vld [vmem:[#allocation8 + $0x2ec] sm:$0xf0]  ;;  %v3631_v16 = vor.u32 %v4542_v7, %v3630_v6  ;;  %s3131_s24 = sshll.u32 %s5408_s17, 3 }
  0x7e   : > { %906 = vmatpush.bf16.msrb.mxu0 %v3207_v17  ;;  %v3486_v14 = vld [vmem:[#allocation8 + $0xc0] sm:$0xf]  ;;  %v4506_v15 = vld [vmem:[#allocation8 + $0xcc] sm:$0xf0]  ;;  %s456_s21 = scalar_lea.vmem %s5392_s9, %s3131_s24 }
  0x7f   : > { %919 = vmatpush.bf16.msrb.mxu1 %v3335_v18  ;;  %v3614_v17 = vld [vmem:[#allocation8 + $0x1c0] sm:$0xf]  ;;  %v4538_v18 = vld [vmem:[#allocation8 + $0x1cc] sm:$0xf0]  ;;  %v3487_v20 = vor.u32 %v4506_v15, %v3486_v14  ;;  %v4540_v15 = vld [vmem:[#allocation8 + $0x1e4] sm:$0xf] }
  0x80   : > { %932 = vmatpush.bf16.msrb.mxu2 %v3211_v19  ;;  %v3759_v19 = vor.u32 %v4574_v13, %v3758_v12  ;;  %v3742_v21 = vld [vmem:[#allocation8 + $0x2c0] sm:$0xf]  ;;  %v4570_v22 = vld [vmem:[#allocation8 + $0x2cc] sm:$0xf0]  ;;  %v3615_v25 = vor.u32 %v4538_v18, %v3614_v17  ;;  %v3504_v12 = vld [vmem:[#allocation8 + $0xf0] sm:$0xf0] }
  0x81   : > { %945 = vmatpush.bf16.msrb.mxu3 %v3339_v23  ;;  %v3470_v23 = vld [vmem:[#allocation8 + $0xa0] sm:$0xf]  ;;  %v4502_v24 = vld [vmem:[#allocation8 + $0xac] sm:$0xf0] }
  0x82   : > { %907 = vmatpush.bf16.msrb.mxu0 %v3191_v29  ;;  %v3886_v26 = vld [vmem:[#allocation8 + $0x3e0] sm:$0xf]  ;;  %v4534_v28 = vld [vmem:[#allocation8 + $0x1ac] sm:$0xf0]  ;;  %v3471_v32 = vor.u32 %v4502_v24, %v3470_v23  ;;  %v4536_v23 = vld [vmem:[#allocation8 + $0x1c4] sm:$0xf] }
  0x83   : > { %920 = vmatpush.bf16.msrb.mxu1 %v3319_v30  ;;  %v3598_v27 = vld [vmem:[#allocation8 + $0x1a0] sm:$0xf]  ;;  %v4606_v29 = vld [vmem:[#allocation8 + $0x3ec] sm:$0xf0]  ;;  %v3743_v30 = vor.u32 %v4570_v22, %v3742_v21  ;;  %v3488_v21 = vld [vmem:[#allocation8 + $0xd0] sm:$0xf0] }
  0x84   : > { %933 = vmatpush.bf16.msrb.mxu2 %v3195_v31  ;;  %v3887_v31 = vor.u32 %v4606_v29, %v3886_v26  ;;  %v3454_v33 = vld [vmem:[#allocation8 + $0x80] sm:$0xf]  ;;  %v4498_v36 = vld [vmem:[#allocation8 + $0x8c] sm:$0xf0]  ;;  %v3599_v37 = vor.u32 %v4534_v28, %v3598_v27  ;;  %v3616_v24 = vld [vmem:[#allocation8 + $0x1d0] sm:$0xf0] }
  0x85   : > { %946 = vmatpush.bf16.msrb.mxu3 %v3323_v35  ;;  %v3726_v34 = vld [vmem:[#allocation8 + $0x2a0] sm:$0xf]  ;;  %v4566_v35 = vld [vmem:[#allocation8 + $0x2ac] sm:$0xf0]  ;;  %v4500_v26 = vld [vmem:[#allocation8 + $0xa4] sm:$0xf]  ;;  %v3619_v28 = vor.u32 %v4536_v23, %v3616_v24 }
  0x86   : > { %908 = vmatpush.bf16.msrb.mxu0 %v3175_v41  ;;  %v3870_v38 = vld [vmem:[#allocation8 + $0x3c0] sm:$0xf]  ;;  %v4602_v39 = vld [vmem:[#allocation8 + $0x3cc] sm:$0xf0]  ;;  %v3727_v42 = vor.u32 %v4566_v35, %v3726_v34  ;;  %v3472_v27 = vld [vmem:[#allocation8 + $0xb0] sm:$0xf0] }
  0x87   : > { %921 = vmatpush.bf16.msrb.mxu1 %v3303_v43  ;;  %v4530_v40 = vld [vmem:[#allocation8 + $0x18c] sm:$0xf0]  ;;  %v3871_v41 = vor.u32 %v4602_v39, %v3870_v38  ;;  %v3438_v43 = vld [vmem:[#allocation8 + $0x60] sm:$0xf]  ;;  %v4532_v29 = vld [vmem:[#allocation8 + $0x1a4] sm:$0xf] }
  0x88   : > { %934 = vmatpush.bf16.msrb.mxu2 %v3179_v44  ;;  %v3710_v44 = vld [vmem:[#allocation8 + $0x280] sm:$0xf]  ;;  %v4562_v45 = vld [vmem:[#allocation8 + $0x28c] sm:$0xf0] }
  0x89   : > { %947 = vmatpush.bf16.msrb.mxu3 %v3307_v47  ;;  %v4494_v46 = vld [vmem:[#allocation8 + $0x6c] sm:$0xf0]  ;;  %v3854_v48 = vld [vmem:[#allocation8 + $0x3a0] sm:$0xf] }
  0x8a   : > { %909 = vmatpush.bf16.msrb.mxu0 %v3159_v55  ;;  %v4598_v49 = vld [vmem:[#allocation8 + $0x3ac] sm:$0xf0]  ;;  %v3566_v51 = vld [vmem:[#allocation8 + $0x160] sm:$0xf]  ;;  %v3711_v55 = vor.u32 %v4562_v45, %v3710_v44  ;;  %v3439_v56 = vor.u32 %v4494_v46, %v3438_v43  ;;  %v4488_v45 = vld [vmem:[#allocation8 + $0x44] sm:$0xf] }
  0x8b   : > { %922 = vmatpush.bf16.msrb.mxu1 %v3287_v57  ;;  %v4526_v52 = vld [vmem:[#allocation8 + $0x16c] sm:$0xf0]  ;;  %v3855_v53 = vor.u32 %v4598_v49, %v3854_v48  ;;  %v3694_v57 = vld [vmem:[#allocation8 + $0x260] sm:$0xf] }
  0x8c   : > { %935 = vmatpush.bf16.msrb.mxu2 %v3163_v58  ;;  %v4558_v58 = vld [vmem:[#allocation8 + $0x26c] sm:$0xf0]  ;;  %v3422_v59 = vld [vmem:[#allocation8 + $0x40] sm:$0xf]  ;;  %v3567_v61 = vor.u32 %v4526_v52, %v3566_v51  ;;  %v4524_v52 = vld [vmem:[#allocation8 + $0x164] sm:$0xf] }
  0x8d   : > { %948 = vmatpush.bf16.msrb.mxu3 %v3291_v62  ;;  %v4490_v60 = vld [vmem:[#allocation8 + $0x4c] sm:$0xf0]  ;;  %v3550_v62 = vld [vmem:[#allocation8 + $0x140] sm:$0xf]  ;;  %v3695_v0 = vor.u32 %v4558_v58, %v3694_v57 }
  0x8e   : > { %910 = vmatpush.bf16.msrb.mxu0 %v3143_v5  ;;  %v4522_v63 = vld [vmem:[#allocation8 + $0x14c] sm:$0xf0]  ;;  %v3423_v1 = vor.u32 %v4490_v60, %v3422_v59  ;;  %v3406_v2 = vld [vmem:[#allocation8 + $0x20] sm:$0xf]  ;;  %v4484_v59 = vld [vmem:[#allocation8 + $0x24] sm:$0xf] }
  0x8f   : > { %923 = vmatpush.bf16.msrb.mxu1 %v3271_v8  ;;  %v4486_v3 = vld [vmem:[#allocation8 + $0x2c] sm:$0xf0]  ;;  %v3551_v4 = vor.u32 %v4522_v63, %v3550_v62  ;;  %v3534_v5 = vld [vmem:[#allocation8 + $0x120] sm:$0xf] }
  0x90   : > { %936 = vmatpush.bf16.msrb.mxu2 %v3147_v9  ;;  %v4518_v6 = vld [vmem:[#allocation8 + $0x12c] sm:$0xf0]  ;;  %v3407_v7 = vor.u32 %v4486_v3, %v3406_v2  ;;  %v3390_v8 = vld [vmem:[#allocation8] sm:$0xf]  ;;  %v3552_v3 = vld [vmem:[#allocation8 + $0x150] sm:$0xf0] }
  0x91   : > { %949 = vmatpush.bf16.msrb.mxu3 %v3275_v10  ;;  %911 = vmatmul.bf16.vlgmr.msrb.gmra.mxu0 %v5265_v50  ;;  %v4482_v9 = vld [vmem:[#allocation8 + $0xc] sm:$0xf0]  ;;  %v4508_v10 = vld [vmem:[#allocation8 + $0xe4] sm:$0xf]  ;;  %v3518_v13 = vld [vmem:[#allocation8 + $0x100] sm:$0xf] }
  0x92   : > { %1745 = vmatpush.bf16.msra.mxu0 %v3503_v11  ;;  %924 = vmatmul.bf16.vlgmr.msrb.gmra.mxu1 %v5267_v54  ;;  %v3535_v11 = vor.u32 %v4518_v6, %v3534_v5  ;;  %v4514_v14 = vld [vmem:[#allocation8 + $0x10c] sm:$0xf0]  ;;  %v3391_v17 = vor.u32 %v4482_v9, %v3390_v8  ;;  %v3507_v18 = vor.u32 %v4508_v10, %v3504_v12  ;;  %v3838_v39 = vld [vmem:[#allocation8 + $0x380] sm:$0xf]  ;;  %v3392_v9 = vld [vmem:[#allocation8 + $0x10] sm:$0xf0] }
  0x93   : > { %1758 = vmatpush.bf16.msra.mxu1 %v3631_v16  ;;  %937 = vmatmul.bf16.vlgmr.msrb.gmra.mxu2 %v5265_v50  ;;  %v3582_v50 = vld [vmem:[#allocation8 + $0x180] sm:$0xf]  ;;  %v3632_v16 = vld [vmem:[#allocation8 + $0x1f0] sm:$0xf0]  ;;  %v4554_v44 = vld [vmem:[#allocation8 + $0x24c] sm:$0xf0] }
  0x94   : > { %950 = vmatmul.bf16.vlgmr.msrb.gmra.mxu3 %v5267_v54  ;;  %1771 = vmatpush.bf16.msra.mxu2 %v3759_v19  ;;  %v3455_v54 = vor.u32 %v4498_v36, %v3454_v33  ;;  %v3583_v47 = vor.u32 %v4530_v40, %v3582_v50  ;;  %v3519_v19 = vor.u32 %v4514_v14, %v3518_v13  ;;  %v3456_v33 = vld [vmem:[#allocation8 + $0x90] sm:$0xf0]  ;;  %v4492_v36 = vld [vmem:[#allocation8 + $0x64] sm:$0xf]  ;;  %v4594_v50 = vld [vmem:[#allocation8 + $0x38c] sm:$0xf0] }
  0x95   : > { %1784 = vmatpush.bf16.msra.mxu3 %v3887_v31  ;;  %v3635_v22 = vor.u32 %v4540_v15, %v3632_v16  ;;  %v3475_v31 = vor.u32 %v4500_v26, %v3472_v27  ;;  %v4528_v40 = vld [vmem:[#allocation8 + $0x184] sm:$0xf]  ;;  %v3678_v43 = vld [vmem:[#allocation8 + $0x240] sm:$0xf]  ;;  %v4590_v51 = vld [vmem:[#allocation8 + $0x36c] sm:$0xf0] }
  0x96   : > { %1746 = vmatpush.bf16.msra.mxu0 %v3487_v20  ;;  %v4504_v20 = vld [vmem:[#allocation8 + $0xc4] sm:$0xf]  ;;  %v3679_v46 = vor.u32 %v4554_v44, %v3678_v43  ;;  %v3822_v49 = vld [vmem:[#allocation8 + $0x360] sm:$0xf]  ;;  %v4550_v58 = vld [vmem:[#allocation8 + $0x22c] sm:$0xf0] }
  0x97   : > { %1759 = vmatpush.bf16.msra.mxu1 %v3615_v25  ;;  %v3491_v25 = vor.u32 %v4504_v20, %v3488_v21  ;;  %v3662_v57 = vld [vmem:[#allocation8 + $0x220] sm:$0xf]  ;;  %v4546_v6 = vld [vmem:[#allocation8 + $0x20c] sm:$0xf0]  ;;  %v4572_v10 = vld [vmem:[#allocation8 + $0x2e4] sm:$0xf] }
  0x98   : > { %1772 = vmatpush.bf16.msra.mxu2 %v3743_v30  ;;  %v3600_v30 = vld [vmem:[#allocation8 + $0x1b0] sm:$0xf0]  ;;  %v3663_v60 = vor.u32 %v4550_v58, %v3662_v57  ;;  %v3806_v63 = vld [vmem:[#allocation8 + $0x340] sm:$0xf]  ;;  %v4582_v15 = vld [vmem:[#allocation8 + $0x32c] sm:$0xf0] }
  0x99   : > { %1785 = vmatpush.bf16.msra.mxu3 %v3871_v41  ;;  %v3603_v34 = vor.u32 %v4532_v29, %v3600_v30  ;;  %v3839_v41 = vor.u32 %v4594_v50, %v3838_v39  ;;  %v3646_v5 = vld [vmem:[#allocation8 + $0x200] sm:$0xf]  ;;  %v4516_v16 = vld [vmem:[#allocation8 + $0x124] sm:$0xf]  ;;  %v3744_v21 = vld [vmem:[#allocation8 + $0x2d0] sm:$0xf0] }
  0x9a   : > { %1747 = vmatpush.bf16.msra.mxu0 %v3471_v32  ;;  %v4496_v32 = vld [vmem:[#allocation8 + $0x84] sm:$0xf]  ;;  %v3647_v8 = vor.u32 %v4546_v6, %v3646_v5  ;;  %v3790_v14 = vld [vmem:[#allocation8 + $0x320] sm:$0xf]  ;;  %v4578_v24 = vld [vmem:[#allocation8 + $0x30c] sm:$0xf0] }
  0x9b   : > { %1760 = vmatpush.bf16.msra.mxu1 %v3599_v37  ;;  %v3459_v35 = vor.u32 %v4496_v32, %v3456_v33  ;;  %v3440_v37 = vld [vmem:[#allocation8 + $0x70] sm:$0xf0]  ;;  %v4568_v20 = vld [vmem:[#allocation8 + $0x2c4] sm:$0xf]  ;;  %v3774_v23 = vld [vmem:[#allocation8 + $0x300] sm:$0xf] }
  0x9c   : > { %1773 = vmatpush.bf16.msra.mxu2 %v3727_v42  ;;  %v3443_v38 = vor.u32 %v4492_v36, %v3440_v37  ;;  %v3584_v42 = vld [vmem:[#allocation8 + $0x190] sm:$0xf0]  ;;  %v4512_v26 = vld [vmem:[#allocation8 + $0x104] sm:$0xf]  ;;  %v3510_v5 = vld [vmem:[#allocation8 + $0xe8] sm:$0xf] }
  0x9d   : > { %1786 = vmatpush.bf16.msra.mxu3 %v3855_v53  ;;  %v3823_v53 = vor.u32 %v4590_v51, %v3822_v49  ;;  %v3520_v27 = vld [vmem:[#allocation8 + $0x110] sm:$0xf0]  ;;  %v4564_v32 = vld [vmem:[#allocation8 + $0x2a4] sm:$0xf]  ;;  %v4511_v6 = vld [vmem:[#allocation8 + $0xf4] sm:$0xf0] }
  0x9e   : > { %1748 = vmatpush.bf16.msra.mxu0 %v3455_v54  ;;  %v3587_v54 = vor.u32 %v4528_v40, %v3584_v42  ;;  %v3523_v29 = vor.u32 %v4512_v26, %v3520_v27  ;;  %v3888_v30 = vld [vmem:[#allocation8 + $0x3f0] sm:$0xf0]  ;;  %v4596_v40 = vld [vmem:[#allocation8 + $0x3a4] sm:$0xf] }
  0x9f   : > { %1761 = vmatpush.bf16.msra.mxu1 %v3583_v47  ;;  %v3424_v47 = vld [vmem:[#allocation8 + $0x50] sm:$0xf0]  ;;  %v4556_v43 = vld [vmem:[#allocation8 + $0x264] sm:$0xf] }
  0xa0   : > { %1774 = vmatpush.bf16.msra.mxu2 %v3711_v55  ;;  %v3427_v48 = vor.u32 %v4488_v45, %v3424_v47  ;;  %v3568_v55 = vld [vmem:[#allocation8 + $0x170] sm:$0xf0]  ;;  %v4552_v51 = vld [vmem:[#allocation8 + $0x244] sm:$0xf] }
  0xa1   : > { %1787 = vmatpush.bf16.msra.mxu3 %v3839_v41  ;;  %v3728_v33 = vld [vmem:[#allocation8 + $0x2b0] sm:$0xf0] }
  0xa2   : > { %1749 = vmatpush.bf16.msra.mxu0 %v3439_v56  ;;  %v3571_v56 = vor.u32 %v4524_v52, %v3568_v55  ;;  %v3872_v36 = vld [vmem:[#allocation8 + $0x3d0] sm:$0xf0] }
  0xa3   : > { %1762 = vmatpush.bf16.msra.mxu1 %v3567_v61  ;;  %v3408_v61 = vld [vmem:[#allocation8 + $0x30] sm:$0xf0] }
  0xa4   : > { %1775 = vmatpush.bf16.msra.mxu2 %v3695_v0  ;;  %v3411_v62 = vor.u32 %v4484_v59, %v3408_v61  ;;  %v4586_v0 = vld [vmem:[#allocation8 + $0x34c] sm:$0xf0]  ;;  %v3712_v39 = vld [vmem:[#allocation8 + $0x290] sm:$0xf0]  ;;  %v4548_v61 = vld [vmem:[#allocation8 + $0x224] sm:$0xf] }
  0xa5   : > { %1788 = vmatpush.bf16.msra.mxu3 %v3823_v53  ;;  %v3807_v2 = vor.u32 %v4586_v0, %v3806_v63  ;;  %v3856_v41 = vld [vmem:[#allocation8 + $0x3b0] sm:$0xf0] }
  0xa6   : > { %1750 = vmatpush.bf16.msra.mxu0 %v3423_v1  ;;  %v4520_v1 = vld [vmem:[#allocation8 + $0x144] sm:$0xf]  ;;  %v3859_v42 = vor.u32 %v4596_v40, %v3856_v41  ;;  %v3696_v44 = vld [vmem:[#allocation8 + $0x270] sm:$0xf0]  ;;  %v4539_v40 = vld [vmem:[#allocation8 + $0x1d4] sm:$0xf0] }
  0xa7   : > { %1763 = vmatpush.bf16.msra.mxu1 %v3551_v4  ;;  %v3555_v4 = vor.u32 %v4520_v1, %v3552_v3  ;;  %v3699_v45 = vor.u32 %v4556_v43, %v3696_v44  ;;  %v3840_v47 = vld [vmem:[#allocation8 + $0x390] sm:$0xf0]  ;;  %v3462_v41 = vld [vmem:[#allocation8 + $0x88] sm:$0xf] }
  0xa8   : > { %1776 = vmatpush.bf16.msra.mxu2 %v3679_v46  ;;  %v4592_v46 = vld [vmem:[#allocation8 + $0x384] sm:$0xf]  ;;  %v3680_v52 = vld [vmem:[#allocation8 + $0x250] sm:$0xf0]  ;;  %v3606_v44 = vld [vmem:[#allocation8 + $0x1a8] sm:$0xf] }
  0xa9   : > { %1789 = vmatpush.bf16.msra.mxu3 %v3807_v2  ;;  %v3843_v49 = vor.u32 %v4592_v46, %v3840_v47  ;;  %v3683_v53 = vor.u32 %v4552_v51, %v3680_v52  ;;  %v3824_v57 = vld [vmem:[#allocation8 + $0x370] sm:$0xf0]  ;;  %v4584_v2 = vld [vmem:[#allocation8 + $0x344] sm:$0xf]  ;;  %v3446_v46 = vld [vmem:[#allocation8 + $0x68] sm:$0xf] }
  0xaa   : > { %1751 = vmatpush.bf16.msra.mxu0 %v3407_v7  ;;  %v4480_v7 = vld [vmem:[#allocation8 + $0x4] sm:$0xf]  ;;  %v3808_v3 = vld [vmem:[#allocation8 + $0x350] sm:$0xf0]  ;;  %v4495_v47 = vld [vmem:[#allocation8 + $0x74] sm:$0xf0] }
  0xab   : > { %1764 = vmatpush.bf16.msra.mxu1 %v3535_v11  ;;  %v3760_v11 = vld [vmem:[#allocation8 + $0x2f0] sm:$0xf0]  ;;  %v3395_v12 = vor.u32 %v4480_v7, %v3392_v9  ;;  %v3811_v7 = vor.u32 %v4584_v2, %v3808_v3  ;;  %v3447_v51 = vor.u32 %v4495_v47, %v3446_v46  ;;  %v3590_v52 = vld [vmem:[#allocation8 + $0x188] sm:$0xf]  ;;  %v4501_v46 = vld [vmem:[#allocation8 + $0xac] sm:$0xf] }
  0xac   : > { %1777 = vmatpush.bf16.msra.mxu2 %v3663_v60  ;;  %v3763_v13 = vor.u32 %v4572_v10, %v3760_v11  ;;  %v3648_v9 = vld [vmem:[#allocation8 + $0x210] sm:$0xf0]  ;;  %v3480_v47 = vld [vmem:[#allocation8 + $0xb8] sm:$0xf0] }
  0xae   : > { %1752 = vmatpush.bf16.msra.mxu0 %v3391_v17  ;;  %v3536_v17 = vld [vmem:[#allocation8 + $0x130] sm:$0xf0] }
  0xaf   : > { %1765 = vmatpush.bf16.msra.mxu1 %v3519_v19  ;;  %v3539_v19 = vor.u32 %v4516_v16, %v3536_v17  ;;  %v4580_v17 = vld [vmem:[#allocation8 + $0x324] sm:$0xf] }
  0xb0   : > { %1778 = vmatpush.bf16.msra.mxu2 %v3647_v8  ;;  %v4544_v8 = vld [vmem:[#allocation8 + $0x204] sm:$0xf] }
  0xb2   : > { %1797 = vmatpush.bf16.msrb.mxu0 %v3507_v18  ;;  %v3791_v18 = vor.u32 %v4582_v15, %v3790_v14  ;;  %v3511_v15 = vor.u32 %v4511_v6, %v3510_v5  ;;  %v3558_v6 = vld [vmem:[#allocation8 + $0x148] sm:$0xf] }
  0xb3   : > { %1810 = vmatpush.bf16.msrb.mxu1 %v3635_v22  ;;  %v3747_v22 = vor.u32 %v4568_v20, %v3744_v21  ;;  %v4507_v20 = vld [vmem:[#allocation8 + $0xd4] sm:$0xf0] }
  0xb4   : > { %1823 = vmatpush.bf16.msrb.mxu2 %v3763_v13  ;;  %1790 = vmatpush.bf16.msra.mxu3 %v3791_v18 }
  0xb6   : > { %1798 = vmatpush.bf16.msrb.mxu0 %v3491_v25  ;;  %v3775_v25 = vor.u32 %v4578_v24, %v3774_v23 }
  0xb7   : > { %1811 = vmatpush.bf16.msrb.mxu1 %v3619_v28  ;;  %v4604_v28 = vld [vmem:[#allocation8 + $0x3e4] sm:$0xf] }
  0xb8   : > { %1824 = vmatpush.bf16.msrb.mxu2 %v3747_v22  ;;  %1791 = vmatpush.bf16.msra.mxu3 %v3775_v25  ;;  %v3792_v22 = vld [vmem:[#allocation8 + $0x330] sm:$0xf0]  ;;  %v3638_v25 = vld [vmem:[#allocation8 + $0x1e8] sm:$0xf] }
  0xb9   : > { %v3795_v24 = vor.u32 %v4580_v17, %v3792_v22  ;;  %v4519_v22 = vld [vmem:[#allocation8 + $0x134] sm:$0xf0] }
  0xba   : > { %1799 = vmatpush.bf16.msrb.mxu0 %v3475_v31  ;;  %v3891_v31 = vor.u32 %v4604_v28, %v3888_v30  ;;  %v4543_v28 = vld [vmem:[#allocation8 + $0x1f4] sm:$0xf0]  ;;  %v3478_v30 = vld [vmem:[#allocation8 + $0xa8] sm:$0xf] }
  0xbb   : > { %1812 = vmatpush.bf16.msrb.mxu1 %v3603_v34  ;;  %v3731_v34 = vor.u32 %v4564_v32, %v3728_v33  ;;  %v3776_v32 = vld [vmem:[#allocation8 + $0x310] sm:$0xf0] }
  0xbc   : > { %1836 = vmatpush.bf16.msrb.mxu3 %v3891_v31  ;;  %v4503_v31 = vld [vmem:[#allocation8 + $0xb4] sm:$0xf0] }
  0xbd   : > { %1825 = vmatpush.bf16.msrb.mxu2 %v3731_v34 }
  0xbe   : > { %1800 = vmatpush.bf16.msrb.mxu0 %v3459_v35  ;;  %v4600_v35 = vld [vmem:[#allocation8 + $0x3c4] sm:$0xf] }
  0xbf   : > { %1813 = vmatpush.bf16.msrb.mxu1 %v3587_v54  ;;  %v3875_v37 = vor.u32 %v4600_v35, %v3872_v36  ;;  %v525_v54 = vld [vmem:[%s393_s18] sm:$0xff]  ;;  %v3639_v35 = vor.u32 %v4543_v28, %v3638_v25  ;;  %v3750_v28 = vld [vmem:[#allocation8 + $0x2c8] sm:$0xf] }
  0xc0   : > { %v528_v1 = vunpack.c.h.bf16 %v525_v54 }
  0xc1   : > { %1837 = vmatpush.bf16.msrb.mxu3 %v3875_v37 }
  0xc2   : > { %1801 = vmatpush.bf16.msrb.mxu0 %v3443_v38  ;;  %v4560_v38 = vld [vmem:[#allocation8 + $0x284] sm:$0xf] }
  0xc3   : > { %1814 = vmatpush.bf16.msrb.mxu1 %v3571_v56  ;;  %v3715_v50 = vor.u32 %v4560_v38, %v3712_v39  ;;  %v4588_v56 = vld [vmem:[#allocation8 + $0x364] sm:$0xf]  ;;  %v3479_v38 = vor.u32 %v4503_v31, %v3478_v30  ;;  %v4571_v31 = vld [vmem:[#allocation8 + $0x2d4] sm:$0xf0] }
  0xc4   : > { %v3827_v60 = vor.u32 %v4588_v56, %v3824_v57  ;;  %v4491_v56 = vld [vmem:[#allocation8 + $0x54] sm:$0xf0] }
  0xc5   : > { %1826 = vmatpush.bf16.msrb.mxu2 %v3715_v50  ;;  %1838 = vmatpush.bf16.msrb.mxu3 %v3859_v42  ;;  %v3622_v50 = vld [vmem:[#allocation8 + $0x1c8] sm:$0xf]  ;;  %v4499_v42 = vld [vmem:[#allocation8 + $0x94] sm:$0xf0] }
  0xc6   : > { %1802 = vmatpush.bf16.msrb.mxu0 %v3427_v48  ;;  %v527_v48 = vunpack.c.l.bf16 %v525_v54  ;;  %v3623_v54 = vor.u32 %v4539_v40, %v3622_v50  ;;  %v3463_v43 = vor.u32 %v4499_v42, %v3462_v41  ;;  %v4607_v50 = vld [vmem:[#allocation8 + $0x3f4] sm:$0xf0]  ;;  %v4541_v40 = vld [vmem:[#allocation8 + $0x1ec] sm:$0xf]  ;;  %v3751_v42 = vor.u32 %v4571_v31, %v3750_v28  ;;  %v3830_v31 = vld [vmem:[#allocation8 + $0x368] sm:$0xf] }
  0xc7   : > { %1815 = vmatpush.bf16.msrb.mxu1 %v3555_v4 }
  0xc9   : > { %1827 = vmatpush.bf16.msrb.mxu2 %v3699_v45  ;;  %1839 = vmatpush.bf16.msrb.mxu3 %v3843_v49  ;;  %v4535_v45 = vld [vmem:[#allocation8 + $0x1b4] sm:$0xf0] }
  0xca   : > { %1803 = vmatpush.bf16.msrb.mxu0 %v3411_v62  ;;  %v3664_v62 = vld [vmem:[#allocation8 + $0x230] sm:$0xf0]  ;;  %v526_v49 = vld [vmem:[%s393_s18 + $0x8] sm:$0xff] }
  0xcb   : > { %1816 = vmatpush.bf16.msrb.mxu1 %v3539_v19  ;;  %v3667_v0 = vor.u32 %v4548_v61, %v3664_v62  ;;  %v3494_v19 = vld [vmem:[#allocation8 + $0xc8] sm:$0xf]  ;;  %v529_v57 = vunpack.c.l.bf16 %v526_v49  ;;  %v4527_v61 = vld [vmem:[#allocation8 + $0x174] sm:$0xf0] }
  0xcc   : > { %v3495_v27 = vor.u32 %v4507_v20, %v3494_v19 }
  0xcd   : > { %1828 = vmatpush.bf16.msrb.mxu2 %v3683_v53  ;;  %1840 = vmatpush.bf16.msrb.mxu3 %v3827_v60  ;;  %v4531_v53 = vld [vmem:[#allocation8 + $0x194] sm:$0xf0]  ;;  %v3574_v60 = vld [vmem:[#allocation8 + $0x168] sm:$0xf] }
  0xce   : > { %1804 = vmatpush.bf16.msrb.mxu0 %v3395_v12  ;;  %v3651_v12 = vor.u32 %v4544_v8, %v3648_v9  ;;  %v3575_v3 = vor.u32 %v4527_v61, %v3574_v60  ;;  %v3398_v8 = vld [vmem:[#allocation8 + $0x8] sm:$0xf]  ;;  %v530_v9 = vunpack.c.h.bf16 %v526_v49  ;;  %v3483_v60 = vor.u32 %v4501_v46, %v3480_v47  ;;  %v4537_v61 = vld [vmem:[#allocation8 + $0x1cc] sm:$0xf]  ;;  %v3560_v46 = vld [vmem:[#allocation8 + $0x158] sm:$0xf0] }
  0xcf   : > { %1817 = vmatpush.bf16.msrb.mxu1 %v3523_v29  ;;  %v4576_v29 = vld [vmem:[#allocation8 + $0x304] sm:$0xf] }
  0xd0   : > { %v3779_v34 = vor.u32 %v4576_v29, %v3776_v32  ;;  %v4505_v32 = vld [vmem:[#allocation8 + $0xcc] sm:$0xf] }
  0xd1   : > { %1829 = vmatpush.bf16.msrb.mxu2 %v3667_v0  ;;  %1841 = vmatpush.bf16.msrb.mxu3 %v3811_v7  ;;  %v4487_v0 = vld [vmem:[#allocation8 + $0x34] sm:$0xf0] }
  0xd2   : > { %v4523_v7 = vld [vmem:[#allocation8 + $0x154] sm:$0xf0] }
  0xd5   : > { %1830 = vmatpush.bf16.msrb.mxu2 %v3651_v12  ;;  %1842 = vmatpush.bf16.msrb.mxu3 %v3795_v24  ;;  %v4575_v12 = vld [vmem:[#allocation8 + $0x2f4] sm:$0xf0] }
  0xd9   : > { %1843 = vmatpush.bf16.msrb.mxu3 %v3779_v34 }
  0xee   : > { %v860_v55 = vpop.f32.mrf.mxu0 }
  0xef   : > { %v861_v58 = vadd.f32 %v860_v55, %v527_v48  ;;  %v873_v59 = vpop.f32.mrf.mxu1  ;;  %v3607_v48 = vor.u32 %v4535_v45, %v3606_v44  ;;  %v3430_v55 = vld [vmem:[#allocation8 + $0x48] sm:$0xf]  ;;  %v4567_v45 = vld [vmem:[#allocation8 + $0x2b4] sm:$0xf0] }
  0xf0   : > { %v3734_v44 = vld [vmem:[#allocation8 + $0x2a8] sm:$0xf] }
  0xf1   : > { %v874_v63 = vadd.f32 %v873_v59, %v861_v58  ;;  %v3591_v58 = vor.u32 %v4531_v53, %v3590_v52  ;;  %v3431_v59 = vor.u32 %v4491_v56, %v3430_v55  ;;  %v3878_v55 = vld [vmem:[#allocation8 + $0x3c8] sm:$0xf]  ;;  %v4603_v56 = vld [vmem:[#allocation8 + $0x3d4] sm:$0xf0] }
  0xf3   : > { %v955_v4 = vmul.f32 0.2, %v874_v63 }
  0xf5   : > { %v959_v10 = vmax.f32 %v874_v63, %v955_v4  ;;  %v3414_v63 = vld [vmem:[#allocation8 + $0x28] sm:$0xf] }
  0xf6   : > { %v886_v11 = vpop.f32.mrf.mxu2  ;;  %v862_v16 = vpop.f32.mrf.mxu0  ;;  %v3415_v5 = vor.u32 %v4487_v0, %v3414_v63  ;;  %v3718_v63 = vld [vmem:[#allocation8 + $0x288] sm:$0xf]  ;;  %v4563_v0 = vld [vmem:[#allocation8 + $0x294] sm:$0xf0] }
  0xf7   : > { %v887_v13 = vadd.f32 %v886_v11, %v528_v1  ;;  %v899_v14 = vpop.f32.mrf.mxu3  ;;  %v5279_v18 = vpack.c.bf16 %v959_v10, %v959_v10  ;;  %v875_v21 = vpop.f32.mrf.mxu1  ;;  %v4483_v10 = vld [vmem:[#allocation8 + $0x14] sm:$0xf0]  ;;  %v3766_v11 = vld [vmem:[#allocation8 + $0x2e8] sm:$0xf]  ;;  %v3559_v16 = vor.u32 %v4523_v7, %v3558_v6  ;;  %v3719_v6 = vor.u32 %v4563_v0, %v3718_v63  ;;  %v3544_v63 = vld [vmem:[#allocation8 + $0x138] sm:$0xf0] }
  0xf8   : > { %v3399_v20 = vor.u32 %v4483_v10, %v3398_v8  ;;  %v3542_v21 = vld [vmem:[#allocation8 + $0x128] sm:$0xf]  ;;  %v4599_v8 = vld [vmem:[#allocation8 + $0x3b4] sm:$0xf0]  ;;  %v3608_v10 = vld [vmem:[#allocation8 + $0x1b8] sm:$0xf0] }
  0xf9   : > { %v900_v23 = vadd.f32 %v899_v14, %v887_v13  ;;  %1753 = vmatmul.bf16.vlgmr.msra.gmra.mxu0 %v5279_v18  ;;  %v4509_v14 = vld [vmem:[#allocation8 + $0xec] sm:$0xf] }
  0xfa   : > { %1849 = vmatpush.bf16.msra.mxu0 %v3511_v15  ;;  %v3512_v15 = vld [vmem:[#allocation8 + $0xf8] sm:$0xf0] }
  0xfb   : > { %v956_v26 = vmul.f32 0.2, %v900_v23 }
  0xfd   : > { %v960_v33 = vmax.f32 %v900_v23, %v956_v26  ;;  %v3767_v26 = vor.u32 %v4575_v12, %v3766_v11  ;;  %v4493_v11 = vld [vmem:[#allocation8 + $0x6c] sm:$0xf]  ;;  %v3448_v12 = vld [vmem:[#allocation8 + $0x78] sm:$0xf0] }
  0xfe   : > { %v888_v36 = vpop.f32.mrf.mxu2  ;;  %1850 = vmatpush.bf16.msra.mxu0 %v3495_v27  ;;  %v3515_v27 = vor.u32 %v4509_v14, %v3512_v15  ;;  %v4559_v14 = vld [vmem:[#allocation8 + $0x274] sm:$0xf0] }
  0xff   : > { %v5282_v37 = vpack.c.bf16 %v960_v33, %v960_v33  ;;  %v901_v39 = vpop.f32.mrf.mxu3  ;;  %v3496_v33 = vld [vmem:[#allocation8 + $0xd8] sm:$0xf0]  ;;  %v3526_v36 = vld [vmem:[#allocation8 + $0x108] sm:$0xf] }
 0x100   : > { %v3894_v39 = vld [vmem:[#allocation8 + $0x3e8] sm:$0xf] }
 0x101   : > { %1766 = vmatmul.bf16.vlgmr.msra.gmra.mxu1 %v5282_v37  ;;  %v3895_v52 = vor.u32 %v4607_v50, %v3894_v39  ;;  %v3416_v39 = vld [vmem:[#allocation8 + $0x38] sm:$0xf0]  ;;  %v3670_v50 = vld [vmem:[#allocation8 + $0x228] sm:$0xf] }
 0x102   : > { %1862 = vmatpush.bf16.msra.mxu1 %v3639_v35  ;;  %1851 = vmatpush.bf16.msra.mxu0 %v3479_v38  ;;  %v3543_v35 = vor.u32 %v4519_v22, %v3542_v21  ;;  %v4515_v38 = vld [vmem:[#allocation8 + $0x114] sm:$0xf0]  ;;  %v4529_v21 = vld [vmem:[#allocation8 + $0x18c] sm:$0xf]  ;;  %v3592_v22 = vld [vmem:[#allocation8 + $0x198] sm:$0xf0] }
 0x103   : > { %v3527_v49 = vor.u32 %v4515_v38, %v3526_v36  ;;  %v4485_v38 = vld [vmem:[#allocation8 + $0x2c] sm:$0xf] }
 0x106   : > { %1863 = vmatpush.bf16.msra.mxu1 %v3623_v54  ;;  %1852 = vmatpush.bf16.msra.mxu0 %v3463_v43  ;;  %v3499_v54 = vor.u32 %v4505_v32, %v3496_v33  ;;  %v3640_v43 = vld [vmem:[#allocation8 + $0x1f8] sm:$0xf0]  ;;  %v4591_v33 = vld [vmem:[#allocation8 + $0x374] sm:$0xf0] }
 0x107   : > { %v3643_v53 = vor.u32 %v4541_v40, %v3640_v43  ;;  %v4551_v40 = vld [vmem:[#allocation8 + $0x234] sm:$0xf0]  ;;  %v3419_v43 = vor.u32 %v4485_v38, %v3416_v39  ;;  %v4593_v38 = vld [vmem:[#allocation8 + $0x38c] sm:$0xf]  ;;  %v3848_v39 = vld [vmem:[#allocation8 + $0x398] sm:$0xf0] }
 0x108   : > { %v3671_v47 = vor.u32 %v4551_v40, %v3670_v50  ;;  %v4553_v40 = vld [vmem:[#allocation8 + $0x24c] sm:$0xf] }
 0x109   : > { %1805 = vmatmul.bf16.vlgmr.msrb.gmra.mxu0 %v5279_v18 }
 0x10a   : > { %1864 = vmatpush.bf16.msra.mxu1 %v3607_v48  ;;  %1853 = vmatpush.bf16.msra.mxu0 %v3447_v51 }
 0x10e   : > { %v912_v62 = vpop.f32.mrf.mxu0  ;;  %1865 = vmatpush.bf16.msra.mxu1 %v3591_v58  ;;  %1854 = vmatpush.bf16.msra.mxu0 %v3431_v59  ;;  %v3735_v59 = vor.u32 %v4567_v45, %v3734_v44  ;;  %v4587_v44 = vld [vmem:[#allocation8 + $0x354] sm:$0xf0]  ;;  %v4521_v45 = vld [vmem:[#allocation8 + $0x14c] sm:$0xf] }
 0x10f   : > { %v913_v1 = vadd.f32 %v912_v62, %v529_v57  ;;  %v925_v2 = vpop.f32.mrf.mxu1  ;;  %v3624_v62 = vld [vmem:[#allocation8 + $0x1d8] sm:$0xf0] }
 0x111   : > { %v926_v4 = vadd.f32 %v925_v2, %v913_v1  ;;  %1818 = vmatmul.bf16.vlgmr.msrb.gmra.mxu1 %v5282_v37  ;;  %v4497_v1 = vld [vmem:[#allocation8 + $0x8c] sm:$0xf]  ;;  %v3464_v2 = vld [vmem:[#allocation8 + $0x98] sm:$0xf0] }
 0x112   : > { %1866 = vmatpush.bf16.msra.mxu1 %v3575_v3  ;;  %1855 = vmatpush.bf16.msra.mxu0 %v3415_v5  ;;  %v3879_v3 = vor.u32 %v4603_v56, %v3878_v55  ;;  %v3862_v5 = vld [vmem:[#allocation8 + $0x3a8] sm:$0xf]  ;;  %v3467_v7 = vor.u32 %v4497_v1, %v3464_v2  ;;  %v3563_v55 = vor.u32 %v4521_v45, %v3560_v46  ;;  %v4573_v56 = vld [vmem:[#allocation8 + $0x2ec] sm:$0xf]  ;;  %v3672_v45 = vld [vmem:[#allocation8 + $0x238] sm:$0xf0] }
 0x113   : > { %v957_v13 = vmul.f32 0.2, %v926_v4  ;;  %v3863_v15 = vor.u32 %v4599_v8, %v3862_v5  ;;  %v3752_v5 = vld [vmem:[#allocation8 + $0x2d8] sm:$0xf0]  ;;  %v4513_v8 = vld [vmem:[#allocation8 + $0x10c] sm:$0xf] }
 0x115   : > { %v961_v17 = vmax.f32 %v926_v4, %v957_v13  ;;  %v3627_v4 = vor.u32 %v4537_v61, %v3624_v62  ;;  %v3702_v13 = vld [vmem:[#allocation8 + $0x268] sm:$0xf]  ;;  %v4583_v61 = vld [vmem:[#allocation8 + $0x334] sm:$0xf0]  ;;  %v4517_v62 = vld [vmem:[#allocation8 + $0x12c] sm:$0xf] }
 0x116   : > { %v938_v19 = vpop.f32.mrf.mxu2  ;;  %v914_v25 = vpop.f32.mrf.mxu0  ;;  %1867 = vmatpush.bf16.msra.mxu1 %v3559_v16  ;;  %1856 = vmatpush.bf16.msra.mxu0 %v3399_v20  ;;  %v4595_v20 = vld [vmem:[#allocation8 + $0x394] sm:$0xf0] }
 0x117   : > { %v939_v23 = vadd.f32 %v938_v19, %v530_v9  ;;  %v951_v24 = vpop.f32.mrf.mxu3  ;;  %v5289_v29 = vpack.c.bf16 %v961_v17, %v961_v17  ;;  %v927_v30 = vpop.f32.mrf.mxu1  ;;  %v4533_v9 = vld [vmem:[#allocation8 + $0x1ac] sm:$0xf]  ;;  %v3846_v17 = vld [vmem:[#allocation8 + $0x388] sm:$0xf]  ;;  %v3451_v19 = vor.u32 %v4493_v11, %v3448_v12  ;;  %v3432_v25 = vld [vmem:[#allocation8 + $0x58] sm:$0xf0] }
 0x118   : > { %v3611_v16 = vor.u32 %v4533_v9, %v3608_v10  ;;  %v3847_v28 = vor.u32 %v4595_v20, %v3846_v17  ;;  %v3595_v30 = vor.u32 %v4529_v21, %v3592_v22  ;;  %v3528_v9 = vld [vmem:[#allocation8 + $0x118] sm:$0xf0]  ;;  %v4605_v10 = vld [vmem:[#allocation8 + $0x3ec] sm:$0xf] }
 0x119   : > { %v952_v34 = vadd.f32 %v951_v24, %v939_v23  ;;  %1779 = vmatmul.bf16.vlgmr.msra.gmra.mxu2 %v5289_v29  ;;  %1857 = vmatmul.bf16.vlgmr.msra.gmra.mxu0 %v5279_v18  ;;  %v3703_v23 = vor.u32 %v4559_v14, %v3702_v13  ;;  %v4489_v24 = vld [vmem:[#allocation8 + $0x4c] sm:$0xf]  ;;  %v3896_v11 = vld [vmem:[#allocation8 + $0x3f8] sm:$0xf0]  ;;  %v3531_v14 = vor.u32 %v4513_v8, %v3528_v9  ;;  %v4670_v9 = vld [vmem:[#allocation10 + $0x1ec] sm:$0xf0] }
 0x11a   : > { %1875 = vmatpush.bf16.msra.mxu2 %v3767_v26  ;;  %1901 = vmatpush.bf16.msrb.mxu0 %v3515_v27  ;;  %v3686_v26 = vld [vmem:[#allocation8 + $0x248] sm:$0xf]  ;;  %v4555_v27 = vld [vmem:[#allocation8 + $0x254] sm:$0xf0]  ;;  %v3435_v32 = vor.u32 %v4489_v24, %v3432_v25  ;;  %v3899_v17 = vor.u32 %v4605_v10, %v3896_v11  ;;  %v3880_v20 = vld [vmem:[#allocation8 + $0x3d8] sm:$0xf0] }
 0x11b   : > { %v958_v41 = vmul.f32 0.2, %v952_v34  ;;  %1868 = vmatpush.bf16.msra.mxu1 %v3543_v35  ;;  %v3576_v35 = vld [vmem:[#allocation8 + $0x178] sm:$0xf0]  ;;  %v3687_v36 = vor.u32 %v4555_v27, %v3686_v26  ;;  %v4561_v22 = vld [vmem:[#allocation8 + $0x28c] sm:$0xf] }
 0x11c   : > { %v4014_v24 = vld [vmem:[#allocation10 + $0xe0] sm:$0xf]  ;;  %v4638_v25 = vld [vmem:[#allocation10 + $0xec] sm:$0xf0] }
 0x11d   : > { %v962_v48 = vmax.f32 %v952_v34, %v958_v41  ;;  %v4525_v34 = vld [vmem:[#allocation8 + $0x16c] sm:$0xf]  ;;  %v3831_v41 = vor.u32 %v4591_v33, %v3830_v31  ;;  %v4015_v27 = vor.u32 %v4638_v25, %v4014_v24  ;;  %v3934_v10 = vld [vmem:[#allocation10 + $0x40] sm:$0xf]  ;;  %v4618_v11 = vld [vmem:[#allocation10 + $0x4c] sm:$0xf0] }
 0x11e   : > { %v940_v51 = vpop.f32.mrf.mxu2  ;;  %1876 = vmatpush.bf16.msra.mxu2 %v3751_v42  ;;  %1902 = vmatpush.bf16.msrb.mxu0 %v3499_v54  ;;  %v3579_v42 = vor.u32 %v4525_v34, %v3576_v35  ;;  %v3814_v54 = vld [vmem:[#allocation8 + $0x348] sm:$0xf]  ;;  %v4597_v31 = vld [vmem:[#allocation8 + $0x3ac] sm:$0xf]  ;;  %v3704_v34 = vld [vmem:[#allocation8 + $0x278] sm:$0xf0] }
 0x11f   : > { %v5293_v57 = vpack.c.bf16 %v962_v48, %v962_v48  ;;  %v953_v58 = vpop.f32.mrf.mxu3  ;;  %1869 = vmatpush.bf16.msra.mxu1 %v3527_v49  ;;  %v4481_v48 = vld [vmem:[#allocation8 + $0xc] sm:$0xf]  ;;  %v3400_v49 = vld [vmem:[#allocation8 + $0x18] sm:$0xf0]  ;;  %v3654_v51 = vld [vmem:[#allocation8 + $0x208] sm:$0xf] }
 0x120   : > { %v3768_v58 = vld [vmem:[#allocation8 + $0x2f8] sm:$0xf0]  ;;  %v4557_v33 = vld [vmem:[#allocation8 + $0x26c] sm:$0xf]  ;;  %v4094_v24 = vld [vmem:[#allocation10 + $0x180] sm:$0xf] }
 0x121   : > { %1792 = vmatmul.bf16.vlgmr.msra.gmra.mxu3 %v5293_v57  ;;  %v3771_v1 = vor.u32 %v4573_v56, %v3768_v58  ;;  %v3707_v50 = vor.u32 %v4557_v33, %v3704_v34  ;;  %v3800_v56 = vld [vmem:[#allocation8 + $0x338] sm:$0xf0]  ;;  %v4270_v33 = vld [vmem:[#allocation10 + $0x2e0] sm:$0xf] }
 0x122   : > { %1888 = vmatpush.bf16.msra.mxu3 %v3895_v52  ;;  %1877 = vmatpush.bf16.msra.mxu2 %v3735_v59  ;;  %v4547_v52 = vld [vmem:[#allocation8 + $0x214] sm:$0xf0]  ;;  %v3798_v59 = vld [vmem:[#allocation8 + $0x328] sm:$0xf] }
 0x123   : > { %1914 = vmatpush.bf16.msrb.mxu1 %v3643_v53  ;;  %1903 = vmatpush.bf16.msrb.mxu0 %v3483_v60  ;;  %v3815_v53 = vor.u32 %v4587_v44, %v3814_v54  ;;  %v3403_v60 = vor.u32 %v4481_v48, %v3400_v49  ;;  %v3655_v0 = vor.u32 %v4547_v52, %v3654_v51  ;;  %v3832_v54 = vld [vmem:[#allocation8 + $0x378] sm:$0xf0]  ;;  %v4549_v44 = vld [vmem:[#allocation8 + $0x22c] sm:$0xf] }
 0x124   : > { %1870 = vmatmul.bf16.vlgmr.msra.gmra.mxu1 %v5282_v37  ;;  %v3799_v2 = vor.u32 %v4583_v61, %v3798_v59  ;;  %v3816_v48 = vld [vmem:[#allocation8 + $0x358] sm:$0xf0]  ;;  %v3675_v49 = vor.u32 %v4549_v44, %v3672_v45  ;;  %v4545_v51 = vld [vmem:[#allocation8 + $0x20c] sm:$0xf] }
 0x125   : > { %v3656_v52 = vld [vmem:[#allocation8 + $0x218] sm:$0xf0] }
 0x126   : > { %1889 = vmatpush.bf16.msra.mxu3 %v3879_v3  ;;  %1878 = vmatpush.bf16.msra.mxu2 %v3719_v6  ;;  %v3547_v3 = vor.u32 %v4517_v62, %v3544_v63  ;;  %v3782_v6 = vld [vmem:[#allocation8 + $0x308] sm:$0xf]  ;;  %v3659_v58 = vor.u32 %v4545_v51, %v3656_v52  ;;  %v3784_v61 = vld [vmem:[#allocation8 + $0x318] sm:$0xf0]  ;;  %v3982_v63 = vld [vmem:[#allocation10 + $0xa0] sm:$0xf] }
 0x127   : > { %1915 = vmatpush.bf16.msrb.mxu1 %v3627_v4  ;;  %1904 = vmatpush.bf16.msrb.mxu0 %v3467_v7  ;;  %v4569_v4 = vld [vmem:[#allocation8 + $0x2cc] sm:$0xf]  ;;  %v4579_v7 = vld [vmem:[#allocation8 + $0x314] sm:$0xf0]  ;;  %v4238_v52 = vld [vmem:[#allocation10 + $0x2a0] sm:$0xf] }
 0x128   : > { %v3755_v12 = vor.u32 %v4569_v4, %v3752_v5  ;;  %v3783_v13 = vor.u32 %v4579_v7, %v3782_v6  ;;  %v3950_v5 = vld [vmem:[#allocation10 + $0x60] sm:$0xf]  ;;  %v4622_v6 = vld [vmem:[#allocation10 + $0x6c] sm:$0xf0] }
 0x129   : > { %1831 = vmatmul.bf16.vlgmr.msrb.gmra.mxu2 %v5289_v29  ;;  %v4142_v7 = vld [vmem:[#allocation10 + $0x1e0] sm:$0xf]  ;;  %v3951_v8 = vor.u32 %v4622_v6, %v3950_v5  ;;  %v4668_v5 = vld [vmem:[#allocation10 + $0x1e4] sm:$0xf]  ;;  %v4144_v6 = vld [vmem:[#allocation10 + $0x1f0] sm:$0xf0] }
 0x12a   : > { %1890 = vmatpush.bf16.msra.mxu3 %v3863_v15  ;;  %1879 = vmatpush.bf16.msra.mxu2 %v3703_v23  ;;  %v4565_v15 = vld [vmem:[#allocation8 + $0x2ac] sm:$0xf]  ;;  %v3720_v23 = vld [vmem:[#allocation8 + $0x298] sm:$0xf0] }
 0x12b   : > { %1916 = vmatpush.bf16.msrb.mxu1 %v3611_v16  ;;  %1905 = vmatpush.bf16.msrb.mxu0 %v3451_v19  ;;  %v3736_v16 = vld [vmem:[#allocation8 + $0x2b8] sm:$0xf0]  ;;  %v4601_v19 = vld [vmem:[#allocation8 + $0x3cc] sm:$0xf] }
 0x12c   : > { %v3739_v21 = vor.u32 %v4565_v15, %v3736_v16  ;;  %v3883_v26 = vor.u32 %v4601_v19, %v3880_v20  ;;  %v3918_v16 = vld [vmem:[#allocation10 + $0x20] sm:$0xf]  ;;  %v4662_v20 = vld [vmem:[#allocation10 + $0x1ac] sm:$0xf0] }
 0x12d   : > { %v4110_v19 = vld [vmem:[#allocation10 + $0x1a0] sm:$0xf] }
 0x12e   : > { %1891 = vmatpush.bf16.msra.mxu3 %v3847_v28  ;;  %1880 = vmatpush.bf16.msra.mxu2 %v3687_v36  ;;  %v3998_v28 = vld [vmem:[#allocation10 + $0xc0] sm:$0xf] }
 0x12f   : > { %1917 = vmatpush.bf16.msrb.mxu1 %v3595_v30  ;;  %1906 = vmatpush.bf16.msrb.mxu0 %v3435_v32  ;;  %v4634_v30 = vld [vmem:[#allocation10 + $0xcc] sm:$0xf0]  ;;  %v3723_v32 = vor.u32 %v4561_v22, %v3720_v23  ;;  %v3902_v22 = vld [vmem:[#allocation10] sm:$0xf] }
 0x130   : > { %v3999_v35 = vor.u32 %v4634_v30, %v3998_v28  ;;  %v4610_v23 = vld [vmem:[#allocation10 + $0xc] sm:$0xf0]  ;;  %v4016_v28 = vld [vmem:[#allocation10 + $0xf0] sm:$0xf0] }
 0x131   : > { %1844 = vmatmul.bf16.vlgmr.msrb.gmra.mxu3 %v5293_v57  ;;  %v3903_v25 = vor.u32 %v4610_v23, %v3902_v22  ;;  %v3920_v22 = vld [vmem:[#allocation10 + $0x30] sm:$0xf0]  ;;  %v4660_v23 = vld [vmem:[#allocation10 + $0x1a4] sm:$0xf] }
 0x132   : > { %1892 = vmatpush.bf16.msra.mxu3 %v3831_v41  ;;  %1881 = vmatpush.bf16.msra.mxu2 %v3671_v47  ;;  %v3688_v41 = vld [vmem:[#allocation8 + $0x258] sm:$0xf0]  ;;  %v4585_v47 = vld [vmem:[#allocation8 + $0x34c] sm:$0xf] }
 0x133   : > { %1918 = vmatpush.bf16.msrb.mxu1 %v3579_v42  ;;  %1907 = vmatpush.bf16.msrb.mxu0 %v3419_v43  ;;  %v3851_v42 = vor.u32 %v4593_v38, %v3848_v39  ;;  %v3691_v43 = vor.u32 %v4553_v40, %v3688_v41  ;;  %v4000_v38 = vld [vmem:[#allocation10 + $0xd0] sm:$0xf0]  ;;  %v4062_v40 = vld [vmem:[#allocation10 + $0x140] sm:$0xf]  ;;  %v4650_v41 = vld [vmem:[#allocation10 + $0x14c] sm:$0xf0] }
 0x134   : > { %v4063_v44 = vor.u32 %v4650_v41, %v4062_v40  ;;  %v4398_v40 = vld [vmem:[#allocation10 + $0x3e0] sm:$0xf] }
 0x136   : > { %1893 = vmatpush.bf16.msra.mxu3 %v3815_v53  ;;  %1882 = vmatpush.bf16.msra.mxu2 %v3655_v0  ;;  %v3819_v53 = vor.u32 %v4585_v47, %v3816_v48  ;;  %v4630_v0 = vld [vmem:[#allocation10 + $0xac] sm:$0xf0]  ;;  %v4046_v47 = vld [vmem:[#allocation10 + $0x120] sm:$0xf] }
 0x137   : > { %1919 = vmatpush.bf16.msrb.mxu1 %v3563_v55  ;;  %1908 = vmatpush.bf16.msrb.mxu0 %v3403_v60  ;;  %v4581_v55 = vld [vmem:[#allocation8 + $0x32c] sm:$0xf]  ;;  %v4646_v48 = vld [vmem:[#allocation10 + $0x12c] sm:$0xf0] }
 0x138   : > { %v3803_v59 = vor.u32 %v4581_v55, %v3800_v56  ;;  %v4577_v60 = vld [vmem:[#allocation8 + $0x30c] sm:$0xf]  ;;  %v4047_v51 = vor.u32 %v4646_v48, %v4046_v47  ;;  %v4624_v55 = vld [vmem:[#allocation10 + $0x84] sm:$0xf] }
 0x139   : > { %1883 = vmatmul.bf16.vlgmr.msra.gmra.mxu2 %v5289_v29  ;;  %v3787_v62 = vor.u32 %v4577_v60, %v3784_v61  ;;  %v4030_v60 = vld [vmem:[#allocation10 + $0x100] sm:$0xf]  ;;  %v4642_v61 = vld [vmem:[#allocation10 + $0x10c] sm:$0xf0] }
 0x13a   : > { %1927 = vmatpush.bf16.msrb.mxu2 %v3771_v1  ;;  %1894 = vmatpush.bf16.msra.mxu3 %v3799_v2  ;;  %v3983_v1 = vor.u32 %v4630_v0, %v3982_v63  ;;  %v3966_v2 = vld [vmem:[#allocation10 + $0x80] sm:$0xf]  ;;  %v4031_v63 = vor.u32 %v4642_v61, %v4030_v60  ;;  %v4690_v0 = vld [vmem:[#allocation10 + $0x28c] sm:$0xf0]  ;;  %v4256_v61 = vld [vmem:[#allocation10 + $0x2d0] sm:$0xf0] }
 0x13b   : > { %1920 = vmatpush.bf16.msrb.mxu1 %v3547_v3  ;;  %1909 = vmatmul.bf16.vlgmr.msrb.gmra.mxu0 %v5279_v18  ;;  %v3864_v18 = vld [vmem:[#allocation8 + $0x3b8] sm:$0xf0]  ;;  %v4626_v3 = vld [vmem:[#allocation10 + $0x8c] sm:$0xf0] }
 0x13c   : > { %2743 = vmatpush.bf16.msra.mxu0 %v4015_v27  ;;  %v3867_v36 = vor.u32 %v4597_v31, %v3864_v18  ;;  %v3967_v4 = vor.u32 %v4626_v3, %v3966_v2  ;;  %v4636_v27 = vld [vmem:[#allocation10 + $0xe4] sm:$0xf]  ;;  %v4078_v18 = vld [vmem:[#allocation10 + $0x160] sm:$0xf]  ;;  %v3952_v2 = vld [vmem:[#allocation10 + $0x70] sm:$0xf0] }
 0x13d   : > { %v4019_v31 = vor.u32 %v4636_v27, %v4016_v28  ;;  %v4174_v28 = vld [vmem:[#allocation10 + $0x220] sm:$0xf] }
 0x13e   : > { %1928 = vmatpush.bf16.msrb.mxu2 %v3755_v12  ;;  %1895 = vmatpush.bf16.msra.mxu3 %v3783_v13  ;;  %v4143_v12 = vor.u32 %v4670_v9, %v4142_v7  ;;  %v4666_v13 = vld [vmem:[#allocation10 + $0x1cc] sm:$0xf0]  ;;  %v4147_v7 = vor.u32 %v4668_v5, %v4144_v6  ;;  %v4206_v9 = vld [vmem:[#allocation10 + $0x260] sm:$0xf]  ;;  %v4692_v5 = vld [vmem:[#allocation10 + $0x2a4] sm:$0xf] }
 0x13f   : > { %1921 = vmatpush.bf16.msrb.mxu1 %v3531_v14  ;;  %v3935_v14 = vor.u32 %v4618_v11, %v3934_v10  ;;  %v4686_v10 = vld [vmem:[#allocation10 + $0x26c] sm:$0xf0] }
 0x140   : > { %2744 = vmatpush.bf16.msra.mxu0 %v3999_v35  ;;  %v4702_v35 = vld [vmem:[#allocation10 + $0x2ec] sm:$0xf0] }
 0x141   : > { %1896 = vmatmul.bf16.vlgmr.msra.gmra.mxu3 %v5293_v57  ;;  %v4271_v39 = vor.u32 %v4702_v35, %v4270_v33  ;;  %v3904_v33 = vld [vmem:[#allocation10 + $0x10] sm:$0xf0] }
 0x142   : > { %1940 = vmatpush.bf16.msrb.mxu3 %v3899_v17  ;;  %1922 = vmatmul.bf16.vlgmr.msrb.gmra.mxu1 %v5282_v37  ;;  %v4589_v37 = vld [vmem:[#allocation8 + $0x36c] sm:$0xf]  ;;  %v4614_v17 = vld [vmem:[#allocation10 + $0x2c] sm:$0xf0] }
 0x143   : > { %1929 = vmatpush.bf16.msrb.mxu2 %v3739_v21  ;;  %v3835_v46 = vor.u32 %v4589_v37, %v3832_v54  ;;  %2756 = vmatpush.bf16.msra.mxu1 %v4143_v12  ;;  %v4111_v21 = vor.u32 %v4662_v20, %v4110_v19  ;;  %v4698_v37 = vld [vmem:[#allocation10 + $0x2cc] sm:$0xf0]  ;;  %v4628_v54 = vld [vmem:[#allocation10 + $0xa4] sm:$0xf]  ;;  %v4207_v12 = vor.u32 %v4686_v10, %v4206_v9 }
 0x144   : > { %2745 = vmatpush.bf16.msra.mxu0 %v3983_v1  ;;  %v4620_v1 = vld [vmem:[#allocation10 + $0x64] sm:$0xf]  ;;  %v4682_v19 = vld [vmem:[#allocation10 + $0x24c] sm:$0xf0] }
 0x146   : > { %1941 = vmatpush.bf16.msrb.mxu3 %v3883_v26  ;;  %v4658_v26 = vld [vmem:[#allocation10 + $0x18c] sm:$0xf0] }
 0x147   : > { %1930 = vmatpush.bf16.msrb.mxu2 %v3723_v32  ;;  %v4095_v30 = vor.u32 %v4658_v26, %v4094_v24  ;;  %v4654_v32 = vld [vmem:[#allocation10 + $0x16c] sm:$0xf0] }
 0x148   : > { %2746 = vmatpush.bf16.msra.mxu0 %v3967_v4  ;;  %v4079_v34 = vor.u32 %v4654_v32, %v4078_v18  ;;  %v3955_v4 = vor.u32 %v4620_v1, %v3952_v2  ;;  %v4608_v32 = vld [vmem:[#allocation10 + $0x4] sm:$0xf]  ;;  %v4726_v1 = vld [vmem:[#allocation10 + $0x3ac] sm:$0xf0] }
 0x149   : > { %v3907_v35 = vor.u32 %v4608_v32, %v3904_v33  ;;  %v4318_v32 = vld [vmem:[#allocation10 + $0x340] sm:$0xf]  ;;  %v4714_v33 = vld [vmem:[#allocation10 + $0x34c] sm:$0xf0] }
 0x14a   : > { %1942 = vmatpush.bf16.msrb.mxu3 %v3867_v36  ;;  %v4632_v36 = vld [vmem:[#allocation10 + $0xc4] sm:$0xf] }
 0x14b   : > { %1931 = vmatpush.bf16.msrb.mxu2 %v3707_v50  ;;  %v4003_v50 = vor.u32 %v4632_v36, %v4000_v38  ;;  %v4096_v36 = vld [vmem:[#allocation10 + $0x190] sm:$0xf0] }
 0x14c   : > { %2747 = vmatpush.bf16.msra.mxu0 %v3951_v8 }
 0x14e   : > { %1943 = vmatpush.bf16.msrb.mxu3 %v3851_v42  ;;  %v4254_v42 = vld [vmem:[#allocation10 + $0x2c0] sm:$0xf] }
 0x14f   : > { %1932 = vmatpush.bf16.msrb.mxu2 %v3691_v43  ;;  %v3984_v43 = vld [vmem:[#allocation10 + $0xb0] sm:$0xf0]  ;;  %v4255_v45 = vor.u32 %v4698_v37, %v4254_v42  ;;  %v4734_v42 = vld [vmem:[#allocation10 + $0x3ec] sm:$0xf0]  ;;  %v4652_v37 = vld [vmem:[#allocation10 + $0x164] sm:$0xf] }
 0x150   : > { %2748 = vmatpush.bf16.msra.mxu0 %v3935_v14  ;;  %v4664_v14 = vld [vmem:[#allocation10 + $0x1c4] sm:$0xf] }
 0x152   : > { %1944 = vmatpush.bf16.msrb.mxu3 %v3835_v46  ;;  %v3987_v46 = vor.u32 %v4628_v54, %v3984_v43  ;;  %v4080_v54 = vld [vmem:[#allocation10 + $0x170] sm:$0xf0]  ;;  %v4399_v43 = vor.u32 %v4734_v42, %v4398_v40  ;;  %v4302_v42 = vld [vmem:[#allocation10 + $0x320] sm:$0xf] }
 0x153   : > { %1933 = vmatpush.bf16.msrb.mxu2 %v3675_v49 }
 0x156   : > { %1945 = vmatpush.bf16.msrb.mxu3 %v3819_v53  ;;  %v4694_v53 = vld [vmem:[#allocation10 + $0x2ac] sm:$0xf0] }
 0x157   : > { %1934 = vmatpush.bf16.msrb.mxu2 %v3659_v58  ;;  %v4239_v56 = vor.u32 %v4694_v53, %v4238_v52  ;;  %v3968_v58 = vld [vmem:[#allocation10 + $0x90] sm:$0xf0]  ;;  %v4730_v52 = vld [vmem:[#allocation10 + $0x3cc] sm:$0xf0] }
 0x15a   : > { %1946 = vmatpush.bf16.msrb.mxu3 %v3803_v59  ;;  %1935 = vmatmul.bf16.vlgmr.msrb.gmra.mxu2 %v5289_v29  ;;  %v4126_v29 = vld [vmem:[#allocation10 + $0x1c0] sm:$0xf]  ;;  %v3971_v59 = vor.u32 %v4624_v55, %v3968_v58  ;;  %v4064_v58 = vld [vmem:[#allocation10 + $0x150] sm:$0xf0] }
 0x15b   : > { %v4127_v15 = vor.u32 %v4666_v13, %v4126_v29  ;;  %2769 = vmatpush.bf16.msra.mxu2 %v4271_v39  ;;  %v4616_v29 = vld [vmem:[#allocation10 + $0x44] sm:$0xf]  ;;  %v3936_v13 = vld [vmem:[#allocation10 + $0x50] sm:$0xf0]  ;;  %v4158_v39 = vld [vmem:[#allocation10 + $0x200] sm:$0xf] }
 0x15d   : > { %2757 = vmatpush.bf16.msra.mxu1 %v4127_v15  ;;  %v3939_v15 = vor.u32 %v4616_v29, %v3936_v13  ;;  %v4722_v29 = vld [vmem:[#allocation10 + $0x38c] sm:$0xf0] }
 0x15e   : > { %1947 = vmatpush.bf16.msrb.mxu3 %v3787_v62  ;;  %v4222_v62 = vld [vmem:[#allocation10 + $0x280] sm:$0xf] }
 0x15f   : > { %2770 = vmatpush.bf16.msra.mxu2 %v4255_v45  ;;  %v4223_v3 = vor.u32 %v4690_v0, %v4222_v62  ;;  %v4700_v45 = vld [vmem:[#allocation10 + $0x2e4] sm:$0xf]  ;;  %v4366_v0 = vld [vmem:[#allocation10 + $0x3a0] sm:$0xf] }
 0x160   : > { %v4367_v2 = vor.u32 %v4726_v1, %v4366_v0  ;;  %v4006_v1 = vld [vmem:[#allocation10 + $0xc8] sm:$0xf] }
 0x161   : > { %1948 = vmatmul.bf16.vlgmr.msrb.gmra.mxu3 %v5293_v57  ;;  %v3919_v57 = vor.u32 %v4614_v17, %v3918_v16  ;;  %2758 = vmatpush.bf16.msra.mxu1 %v4111_v21  ;;  %v4128_v16 = vld [vmem:[#allocation10 + $0x1d0] sm:$0xf0]  ;;  %v4612_v21 = vld [vmem:[#allocation10 + $0x24] sm:$0xf] }
 0x162   : > { %v4131_v17 = vor.u32 %v4664_v14, %v4128_v16  ;;  %v3923_v24 = vor.u32 %v4612_v21, %v3920_v22  ;;  %2782 = vmatpush.bf16.msra.mxu3 %v4399_v43  ;;  %v4032_v16 = vld [vmem:[#allocation10 + $0x110] sm:$0xf0] }
 0x163   : > { %2749 = vmatpush.bf16.msra.mxu0 %v3919_v57  ;;  %2771 = vmatpush.bf16.msra.mxu2 %v4239_v56  ;;  %v4190_v57 = vld [vmem:[#allocation10 + $0x240] sm:$0xf]  ;;  %v4648_v56 = vld [vmem:[#allocation10 + $0x144] sm:$0xf]  ;;  %v4176_v43 = vld [vmem:[#allocation10 + $0x230] sm:$0xf0] }
 0x164   : > { %v4191_v20 = vor.u32 %v4682_v19, %v4190_v57  ;;  %v4067_v60 = vor.u32 %v4648_v56, %v4064_v58  ;;  %v4224_v19 = vld [vmem:[#allocation10 + $0x290] sm:$0xf0]  ;;  %v4706_v56 = vld [vmem:[#allocation10 + $0x30c] sm:$0xf0] }
 0x165   : > { %2759 = vmatpush.bf16.msra.mxu1 %v4095_v30  ;;  %v4678_v30 = vld [vmem:[#allocation10 + $0x22c] sm:$0xf0] }
 0x166   : > { %v4175_v18 = vor.u32 %v4678_v30, %v4174_v28 }
 0x167   : > { %2750 = vmatpush.bf16.msra.mxu0 %v3903_v25  ;;  %2772 = vmatpush.bf16.msra.mxu2 %v4223_v3  ;;  %v4112_v25 = vld [vmem:[#allocation10 + $0x1b0] sm:$0xf0]  ;;  %v4644_v3 = vld [vmem:[#allocation10 + $0x124] sm:$0xf] }
 0x168   : > { %v4115_v26 = vor.u32 %v4660_v23, %v4112_v25  ;;  %v4334_v23 = vld [vmem:[#allocation10 + $0x360] sm:$0xf] }
 0x169   : > { %2760 = vmatpush.bf16.msra.mxu1 %v4079_v34  ;;  %v4656_v34 = vld [vmem:[#allocation10 + $0x184] sm:$0xf] }
 0x16a   : > { %v4099_v38 = vor.u32 %v4656_v34, %v4096_v36  ;;  %v4192_v36 = vld [vmem:[#allocation10 + $0x250] sm:$0xf0] }
 0x16b   : > { %2795 = vmatpush.bf16.msrb.mxu0 %v4019_v31  ;;  %2773 = vmatpush.bf16.msra.mxu2 %v4207_v12  ;;  %v4350_v12 = vld [vmem:[#allocation10 + $0x380] sm:$0xf] }
 0x16c   : > { %v4351_v14 = vor.u32 %v4722_v29, %v4350_v12  ;;  %v4631_v12 = vld [vmem:[#allocation10 + $0xb4] sm:$0xf0]  ;;  %v4728_v29 = vld [vmem:[#allocation10 + $0x3c4] sm:$0xf] }
 0x16d   : > { %2761 = vmatpush.bf16.msra.mxu1 %v4063_v44  ;;  %v4083_v44 = vor.u32 %v4652_v37, %v4080_v54  ;;  %v4710_v37 = vld [vmem:[#allocation10 + $0x32c] sm:$0xf0]  ;;  %v4676_v54 = vld [vmem:[#allocation10 + $0x224] sm:$0xf] }
 0x16f   : > { %2796 = vmatpush.bf16.msrb.mxu0 %v4003_v50  ;;  %2774 = vmatpush.bf16.msra.mxu2 %v4191_v20  ;;  %v4674_v50 = vld [vmem:[#allocation10 + $0x20c] sm:$0xf0] }
 0x170   : > { %v4159_v41 = vor.u32 %v4674_v50, %v4158_v39 }
 0x171   : > { %2762 = vmatpush.bf16.msra.mxu1 %v4047_v51  ;;  %v4382_v51 = vld [vmem:[#allocation10 + $0x3c0] sm:$0xf] }
 0x172   : > { %v4383_v55 = vor.u32 %v4730_v52, %v4382_v51 }
 0x173   : > { %2797 = vmatpush.bf16.msrb.mxu0 %v3987_v46  ;;  %2775 = vmatpush.bf16.msra.mxu2 %v4175_v18  ;;  %v4272_v46 = vld [vmem:[#allocation10 + $0x2f0] sm:$0xf0] }
 0x174   : > { %v4275_v47 = vor.u32 %v4700_v45, %v4272_v46  ;;  %2783 = vmatpush.bf16.msra.mxu3 %v4383_v55  ;;  %v4022_v45 = vld [vmem:[#allocation10 + $0xe8] sm:$0xf]  ;;  %v4639_v46 = vld [vmem:[#allocation10 + $0xf4] sm:$0xf0]  ;;  %v4286_v55 = vld [vmem:[#allocation10 + $0x300] sm:$0xf] }
 0x175   : > { %2763 = vmatpush.bf16.msra.mxu1 %v4031_v63  ;;  %v5316_v63 = vld [vmem:[%s5387_s4] sm:$0xf]  ;;  %v4023_v58 = vor.u32 %v4639_v46, %v4022_v45 }
 0x176   : > { %v5305_v49 = vpop.f32.mrf.mxu0  ;;  %v1097_v10 = vperm.slane %v5316_v63, 0  ;;  %v1098_v51 = vperm.slane %v5316_v63, 1 }
 0x177   : > { %2798 = vmatpush.bf16.msrb.mxu0 %v3971_v59  ;;  %2776 = vmatpush.bf16.msra.mxu2 %v4159_v41  ;;  %v4696_v59 = vld [vmem:[#allocation10 + $0x2c4] sm:$0xf] }
 0x178   : > { %v4259_v62 = vor.u32 %v4696_v59, %v4256_v61  ;;  %2784 = vmatpush.bf16.msra.mxu3 %v4367_v2  ;;  %v1755_v21 = vadd.f32 %v5305_v49, %v1097_v10  ;;  %v4319_v49 = vor.u32 %v4714_v33, %v4318_v32  ;;  %v4287_v59 = vor.u32 %v4706_v56, %v4286_v55  ;;  %v4160_v61 = vld [vmem:[#allocation10 + $0x210] sm:$0xf0]  ;;  %v4635_v2 = vld [vmem:[#allocation10 + $0xd4] sm:$0xf0]  ;;  %v3990_v10 = vld [vmem:[#allocation10 + $0xa8] sm:$0xf] }
 0x179   : > { %2808 = vmatpush.bf16.msrb.mxu1 %v4147_v7  ;;  %v4240_v7 = vld [vmem:[#allocation10 + $0x2b0] sm:$0xf0]  ;;  %v4671_v32 = vld [vmem:[#allocation10 + $0x1f4] sm:$0xf0]  ;;  %v4118_v56 = vld [vmem:[#allocation10 + $0x1a8] sm:$0xf] }
 0x17a   : > { %v4243_v9 = vor.u32 %v4692_v5, %v4240_v7  ;;  %v4615_v55 = vld [vmem:[#allocation10 + $0x34] sm:$0xf0] }
 0x17b   : > { %2799 = vmatpush.bf16.msrb.mxu0 %v3955_v4  ;;  %2821 = vmatpush.bf16.msrb.mxu2 %v4275_v47  ;;  %v4048_v4 = vld [vmem:[#allocation10 + $0x130] sm:$0xf0]  ;;  %v4179_v47 = vor.u32 %v4676_v54, %v4176_v43  ;;  %v1099_v43 = vperm.slane %v5316_v63, 2 }
 0x17c   : > { %v4051_v6 = vor.u32 %v4644_v3, %v4048_v4  ;;  %2785 = vmatpush.bf16.msra.mxu3 %v4351_v14  ;;  %v4400_v4 = vld [vmem:[#allocation10 + $0x3f0] sm:$0xf0] }
 0x17d   : > { %2809 = vmatpush.bf16.msrb.mxu1 %v4131_v17  ;;  %v4688_v17 = vld [vmem:[#allocation10 + $0x284] sm:$0xf]  ;;  %v4384_v14 = vld [vmem:[#allocation10 + $0x3d0] sm:$0xf0] }
 0x17e   : > { %v5307_v8 = vpop.f32.mrf.mxu1  ;;  %v1756_v11 = vpop.f32.mrf.mxu0  ;;  %v4227_v20 = vor.u32 %v4688_v17, %v4224_v19  ;;  %v3991_v17 = vor.u32 %v4631_v12, %v3990_v10  ;;  %v4336_v54 = vld [vmem:[#allocation10 + $0x370] sm:$0xf0]  ;;  %v4708_v10 = vld [vmem:[#allocation10 + $0x324] sm:$0xf] }
 0x17f   : > { %2800 = vmatpush.bf16.msrb.mxu0 %v3939_v15  ;;  %2822 = vmatpush.bf16.msrb.mxu2 %v4259_v62  ;;  %v4640_v15 = vld [vmem:[#allocation10 + $0x104] sm:$0xf]  ;;  %v1768_v30 = vadd.f32 %v5307_v8, %v1755_v21  ;;  %v4303_v8 = vor.u32 %v4710_v37, %v4302_v42  ;;  %v4667_v37 = vld [vmem:[#allocation10 + $0x1d4] sm:$0xf0] }
 0x180   : > { %v4035_v57 = vor.u32 %v4640_v15, %v4032_v16  ;;  %v4732_v62 = vld [vmem:[#allocation10 + $0x3e4] sm:$0xf]  ;;  %v4387_v15 = vor.u32 %v4728_v29, %v4384_v14  ;;  %v4637_v29 = vld [vmem:[#allocation10 + $0xec] sm:$0xf]  ;;  %v4024_v14 = vld [vmem:[#allocation10 + $0xf8] sm:$0xf0] }
 0x181   : > { %2810 = vmatpush.bf16.msrb.mxu1 %v4115_v26  ;;  %v4684_v26 = vld [vmem:[#allocation10 + $0x264] sm:$0xf] }
 0x182   : > { %v4724_v21 = vld [vmem:[#allocation10 + $0x3a4] sm:$0xf] }
 0x183   : > { %2801 = vmatpush.bf16.msrb.mxu0 %v3923_v24  ;;  %2823 = vmatpush.bf16.msrb.mxu2 %v4243_v9  ;;  %v4718_v24 = vld [vmem:[#allocation10 + $0x36c] sm:$0xf0]  ;;  %v4007_v9 = vor.u32 %v4635_v2, %v4006_v1 }
 0x184   : > { %v4335_v25 = vor.u32 %v4718_v24, %v4334_v23 }
 0x185   : > { %2811 = vmatpush.bf16.msrb.mxu1 %v4099_v38 }
 0x186   : > { %v1769_v27 = vpop.f32.mrf.mxu1  ;;  %v5309_v31 = vpop.f32.mrf.mxu0  ;;  %2786 = vmatpush.bf16.msra.mxu3 %v4335_v25 }
 0x187   : > { %2802 = vmatpush.bf16.msrb.mxu0 %v3907_v35  ;;  %2824 = vmatpush.bf16.msrb.mxu2 %v4227_v20  ;;  %v4208_v27 = vld [vmem:[#allocation10 + $0x270] sm:$0xf0]  ;;  %v4680_v35 = vld [vmem:[#allocation10 + $0x244] sm:$0xf]  ;;  %v4627_v20 = vld [vmem:[#allocation10 + $0x94] sm:$0xf0] }
 0x188   : > { %v4211_v28 = vor.u32 %v4684_v26, %v4208_v27  ;;  %v4195_v39 = vor.u32 %v4680_v35, %v4192_v36  ;;  %v3958_v26 = vld [vmem:[#allocation10 + $0x68] sm:$0xf] }
 0x189   : > { %2812 = vmatpush.bf16.msrb.mxu1 %v4083_v44 }
 0x18a   : > { %2787 = vmatpush.bf16.msra.mxu3 %v4319_v49 }
 0x18b   : > { %2825 = vmatpush.bf16.msrb.mxu2 %v4211_v28  ;;  %v4623_v28 = vld [vmem:[#allocation10 + $0x74] sm:$0xf0] }
 0x18d   : > { %2813 = vmatpush.bf16.msrb.mxu1 %v4067_v60  ;;  %v4672_v60 = vld [vmem:[#allocation10 + $0x204] sm:$0xf] }
 0x18e   : > { %v5311_v48 = vpop.f32.mrf.mxu1  ;;  %v1808_v53 = vpop.f32.mrf.mxu0  ;;  %2788 = vmatpush.bf16.msra.mxu3 %v4303_v8  ;;  %v4163_v3 = vor.u32 %v4672_v60, %v4160_v61  ;;  %v4716_v8 = vld [vmem:[#allocation10 + $0x364] sm:$0xf]  ;;  %v4320_v60 = vld [vmem:[#allocation10 + $0x350] sm:$0xf0] }
 0x18f   : > { %2826 = vmatpush.bf16.msrb.mxu2 %v4195_v39  ;;  %v4339_v45 = vor.u32 %v4716_v8, %v4336_v54 }
 0x191   : > { %2814 = vmatpush.bf16.msrb.mxu1 %v4051_v6  ;;  %v4403_v6 = vor.u32 %v4732_v62, %v4400_v4 }
 0x192   : > { %2789 = vmatpush.bf16.msra.mxu3 %v4287_v59  ;;  %v4712_v59 = vld [vmem:[#allocation10 + $0x344] sm:$0xf] }
 0x193   : > { %2827 = vmatpush.bf16.msrb.mxu2 %v4179_v47  ;;  %v4323_v1 = vor.u32 %v4712_v59, %v4320_v60  ;;  %v4038_v59 = vld [vmem:[#allocation10 + $0x108] sm:$0xf]  ;;  %v4643_v60 = vld [vmem:[#allocation10 + $0x114] sm:$0xf0] }
 0x195   : > { %2815 = vmatpush.bf16.msrb.mxu1 %v4035_v57  ;;  %v3974_v57 = vld [vmem:[#allocation10 + $0x88] sm:$0xf] }
 0x196   : > { %v1821_v11 = vpop.f32.mrf.mxu1  ;;  %v5319_v13 = vpop.f32.mrf.mxu0  ;;  %2834 = vmatpush.bf16.msrb.mxu3 %v4403_v6  ;;  %v3975_v27 = vor.u32 %v4627_v20, %v3974_v57  ;;  %v4611_v6 = vld [vmem:[#allocation10 + $0x14] sm:$0xf0]  ;;  %v4086_v20 = vld [vmem:[#allocation10 + $0x168] sm:$0xf] }
 0x197   : > { %2828 = vmatpush.bf16.msrb.mxu2 %v4163_v3  ;;  %v1807_v11 = vadd.f32 %v5309_v31, %v1098_v51  ;;  %v1859_v61 = vadd.f32 %v5319_v13, %v1099_v43 }
 0x199   : > { %v1820_v16 = vadd.f32 %v5311_v48, %v1807_v11  ;;  %v4720_v48 = vld [vmem:[#allocation10 + $0x384] sm:$0xf]  ;;  %v4304_v11 = vld [vmem:[#allocation10 + $0x330] sm:$0xf0] }
 0x19a   : > { %2835 = vmatpush.bf16.msrb.mxu3 %v4387_v15  ;;  %v4307_v15 = vor.u32 %v4708_v10, %v4304_v11  ;;  %v4214_v10 = vld [vmem:[#allocation10 + $0x268] sm:$0xf] }
 0x19c   : > { %v1780_v22 = vpop.f32.mrf.mxu2 }
 0x19d   : > { %v1781_v38 = vadd.f32 %v1780_v22, %v1768_v30  ;;  %v4368_v22 = vld [vmem:[#allocation10 + $0x3b0] sm:$0xf0]  ;;  %v4150_v30 = vld [vmem:[#allocation10 + $0x1e8] sm:$0xf] }
 0x19e   : > { %v1860_v34 = vpop.f32.mrf.mxu0  ;;  %v4371_v24 = vor.u32 %v4724_v21, %v4368_v22  ;;  %v4151_v39 = vor.u32 %v4671_v32, %v4150_v30  ;;  %v4655_v21 = vld [vmem:[#allocation10 + $0x174] sm:$0xf0]  ;;  %v4278_v22 = vld [vmem:[#allocation10 + $0x2e8] sm:$0xf] }
 0x19f   : > { %v4352_v34 = vld [vmem:[#allocation10 + $0x390] sm:$0xf0] }
 0x1a0   : > { %2836 = vmatpush.bf16.msrb.mxu3 %v4371_v24  ;;  %v4355_v35 = vor.u32 %v4720_v48, %v4352_v34  ;;  %v4703_v24 = vld [vmem:[#allocation10 + $0x2f4] sm:$0xf0] }
 0x1a1   : > { %v5323_v18 = vpop.f32.mrf.mxu1  ;;  %v4279_v48 = vor.u32 %v4703_v24, %v4278_v22  ;;  %v3928_v22 = vld [vmem:[#allocation10 + $0x38] sm:$0xf0] }
 0x1a2   : > { %v1872_v2 = vadd.f32 %v5323_v18, %v1859_v61  ;;  %v4230_v61 = vld [vmem:[#allocation10 + $0x288] sm:$0xf]  ;;  %v4120_v24 = vld [vmem:[#allocation10 + $0x1b8] sm:$0xf0] }
 0x1a4   : > { %v1793_v50 = vpop.f32.mrf.mxu3  ;;  %v1782_v41 = vpop.f32.mrf.mxu2  ;;  %2837 = vmatpush.bf16.msrb.mxu3 %v4355_v35  ;;  %v4070_v35 = vld [vmem:[#allocation10 + $0x148] sm:$0xf] }
 0x1a5   : > { %v1794_v40 = vadd.f32 %v1793_v50, %v1781_v38  ;;  %v3959_v38 = vor.u32 %v4623_v28, %v3958_v26  ;;  %v3942_v50 = vld [vmem:[#allocation10 + $0x48] sm:$0xf]  ;;  %v4288_v26 = vld [vmem:[#allocation10 + $0x310] sm:$0xf0]  ;;  %v4008_v28 = vld [vmem:[#allocation10 + $0xd8] sm:$0xf0] }
 0x1a6   : > { %v4134_v41 = vld [vmem:[#allocation10 + $0x1c8] sm:$0xf] }
 0x1a7   : > { %v1953_v44 = vmul.f32 0.2, %v1794_v40 }
 0x1a8   : > { %2838 = vmatpush.bf16.msrb.mxu3 %v4339_v45  ;;  %v4647_v45 = vld [vmem:[#allocation10 + $0x134] sm:$0xf0] }
 0x1a9   : > { %v1957_v52 = vmax.f32 %v1794_v40, %v1953_v44  ;;  %v1873_v53 = vpop.f32.mrf.mxu1  ;;  %v4619_v40 = vld [vmem:[#allocation10 + $0x54] sm:$0xf0] }
 0x1aa   : > { %v3943_v51 = vor.u32 %v4619_v40, %v3942_v50  ;;  %v3926_v53 = vld [vmem:[#allocation10 + $0x28] sm:$0xf]  ;;  %v4699_v50 = vld [vmem:[#allocation10 + $0x2d4] sm:$0xf0]  ;;  %v4629_v40 = vld [vmem:[#allocation10 + $0xac] sm:$0xf] }
 0x1ab   : > { %v5326_v0 = vpack.c.bf16 %v1957_v52, %v1957_v52  ;;  %v4135_v52 = vor.u32 %v4667_v37, %v4134_v41  ;;  %v3927_v3 = vor.u32 %v4615_v55, %v3926_v53  ;;  %v3992_v41 = vld [vmem:[#allocation10 + $0xb8] sm:$0xf0] }
 0x1ac   : > { %v1795_v5 = vpop.f32.mrf.mxu3  ;;  %v1832_v7 = vpop.f32.mrf.mxu2  ;;  %2839 = vmatpush.bf16.msrb.mxu3 %v4323_v1  ;;  %v3995_v43 = vor.u32 %v4629_v40, %v3992_v41  ;;  %v3976_v53 = vld [vmem:[#allocation10 + $0x98] sm:$0xf0]  ;;  %v4621_v1 = vld [vmem:[#allocation10 + $0x6c] sm:$0xf]  ;;  %v4166_v40 = vld [vmem:[#allocation10 + $0x208] sm:$0xf] }
 0x1ad   : > { %2751 = vmatmul.bf16.vlgmr.msra.gmra.mxu0 %v5326_v0  ;;  %v1833_v19 = vadd.f32 %v1832_v7, %v1820_v16  ;;  %v3910_v5 = vld [vmem:[#allocation10 + $0x8] sm:$0xf]  ;;  %v4675_v41 = vld [vmem:[#allocation10 + $0x214] sm:$0xf0] }
 0x1ae   : > { %2847 = vmatpush.bf16.msra.mxu0 %v4023_v58  ;;  %v4663_v58 = vld [vmem:[#allocation10 + $0x1b4] sm:$0xf0]  ;;  %v4102_v7 = vld [vmem:[#allocation10 + $0x188] sm:$0xf]  ;;  %v3911_v57 = vor.u32 %v4611_v6, %v3910_v5  ;;  %v4039_v5 = vor.u32 %v4643_v60, %v4038_v59  ;;  %v1100_v6 = vperm.slane %v5316_v63, 3 }
 0x1af   : > { %v4119_v4 = vor.u32 %v4663_v58, %v4118_v56  ;;  %v4390_v60 = vld [vmem:[#allocation10 + $0x3c8] sm:$0xf] }
 0x1b0   : > { %2840 = vmatpush.bf16.msrb.mxu3 %v4307_v15  ;;  %v4665_v15 = vld [vmem:[#allocation10 + $0x1cc] sm:$0xf] }
 0x1b2   : > { %2848 = vmatpush.bf16.msra.mxu0 %v4007_v9  ;;  %v4659_v9 = vld [vmem:[#allocation10 + $0x194] sm:$0xf0] }
 0x1b4   : > { %v1845_v23 = vpop.f32.mrf.mxu3  ;;  %v1834_v31 = vpop.f32.mrf.mxu2 }
 0x1b5   : > { %v1846_v25 = vadd.f32 %v1845_v23, %v1833_v19  ;;  %v4103_v19 = vor.u32 %v4659_v9, %v4102_v7  ;;  %v4027_v23 = vor.u32 %v4637_v29, %v4024_v14  ;;  %v4617_v29 = vld [vmem:[#allocation10 + $0x4c] sm:$0xf]  ;;  %v3944_v14 = vld [vmem:[#allocation10 + $0x58] sm:$0xf0] }
 0x1b6   : > { %2849 = vmatpush.bf16.msra.mxu0 %v3991_v17 }
 0x1b7   : > { %v1954_v33 = vmul.f32 0.2, %v1846_v25 }
 0x1b8   : > { %v5331_v49 = vpop.f32.mrf.mxu0 }
 0x1b9   : > { %v1958_v36 = vmax.f32 %v1846_v25, %v1954_v33  ;;  %v4704_v25 = vld [vmem:[#allocation10 + $0x304] sm:$0xf]  ;;  %v4087_v33 = vor.u32 %v4655_v21, %v4086_v20  ;;  %v1911_v63 = vadd.f32 %v5331_v49, %v1100_v6  ;;  %v4683_v20 = vld [vmem:[#allocation10 + $0x254] sm:$0xf0]  ;;  %v4613_v21 = vld [vmem:[#allocation10 + $0x2c] sm:$0xf] }
 0x1ba   : > { %2850 = vmatpush.bf16.msra.mxu0 %v3975_v27  ;;  %v4633_v27 = vld [vmem:[#allocation10 + $0xcc] sm:$0xf]  ;;  %v4291_v30 = vor.u32 %v4704_v25, %v4288_v26 }
 0x1bb   : > { %v5333_v42 = vpack.c.bf16 %v1958_v36, %v1958_v36  ;;  %v4011_v34 = vor.u32 %v4633_v27, %v4008_v28  ;;  %v4651_v36 = vld [vmem:[#allocation10 + $0x154] sm:$0xf0]  ;;  %v4182_v27 = vld [vmem:[#allocation10 + $0x228] sm:$0xf] }
 0x1bc   : > { %v1847_v44 = vpop.f32.mrf.mxu3  ;;  %v1884_v47 = vpop.f32.mrf.mxu2  ;;  %2841 = vmatpush.bf16.msrb.mxu3 %v4291_v30  ;;  %v4071_v8 = vor.u32 %v4651_v36, %v4070_v35  ;;  %v4679_v30 = vld [vmem:[#allocation10 + $0x234] sm:$0xf0]  ;;  %v4104_v35 = vld [vmem:[#allocation10 + $0x198] sm:$0xf0] }
 0x1bd   : > { %2764 = vmatmul.bf16.vlgmr.msra.gmra.mxu1 %v5333_v42  ;;  %2803 = vmatmul.bf16.vlgmr.msrb.gmra.mxu0 %v5326_v0  ;;  %v1885_v12 = vadd.f32 %v1884_v47, %v1872_v2  ;;  %v4054_v44 = vld [vmem:[#allocation10 + $0x128] sm:$0xf]  ;;  %v3960_v2 = vld [vmem:[#allocation10 + $0x78] sm:$0xf0] }
 0x1be   : > { %2851 = vmatpush.bf16.msra.mxu0 %v3959_v38  ;;  %2860 = vmatpush.bf16.msra.mxu1 %v4151_v39  ;;  %v4262_v38 = vld [vmem:[#allocation10 + $0x2c8] sm:$0xf]  ;;  %v4055_v55 = vor.u32 %v4647_v45, %v4054_v44  ;;  %v3963_v9 = vor.u32 %v4621_v1, %v3960_v2  ;;  %v4653_v44 = vld [vmem:[#allocation10 + $0x16c] sm:$0xf]  ;;  %v4088_v45 = vld [vmem:[#allocation10 + $0x178] sm:$0xf0] }
 0x1bf   : > { %v5338_v46 = vpop.f32.mrf.mxu1  ;;  %v4263_v54 = vor.u32 %v4699_v50, %v4262_v38  ;;  %v4246_v47 = vld [vmem:[#allocation10 + $0x2a8] sm:$0xf]  ;;  %v4072_v2 = vld [vmem:[#allocation10 + $0x158] sm:$0xf0] }
 0x1c0   : > { %v1912_v62 = vpop.f32.mrf.mxu0  ;;  %v1924_v25 = vadd.f32 %v5338_v46, %v1911_v63  ;;  %v4183_v46 = vor.u32 %v4679_v30, %v4182_v27  ;;  %v4689_v63 = vld [vmem:[#allocation10 + $0x28c] sm:$0xf] }
 0x1c1   : > { %v4691_v62 = vld [vmem:[#allocation10 + $0x294] sm:$0xf0]  ;;  %v4681_v30 = vld [vmem:[#allocation10 + $0x24c] sm:$0xf] }
 0x1c2   : > { %2852 = vmatpush.bf16.msra.mxu0 %v3943_v51  ;;  %2861 = vmatpush.bf16.msra.mxu1 %v4135_v52  ;;  %v4695_v51 = vld [vmem:[#allocation10 + $0x2b4] sm:$0xf0]  ;;  %v4625_v52 = vld [vmem:[#allocation10 + $0x8c] sm:$0xf]  ;;  %v4231_v7 = vor.u32 %v4691_v62, %v4230_v61 }
 0x1c3   : > { %v4247_v56 = vor.u32 %v4695_v51, %v4246_v47  ;;  %v3979_v58 = vor.u32 %v4625_v52, %v3976_v53  ;;  %v4701_v47 = vld [vmem:[#allocation10 + $0x2ec] sm:$0xf]  ;;  %v4280_v51 = vld [vmem:[#allocation10 + $0x2f8] sm:$0xf0]  ;;  %v4167_v53 = vor.u32 %v4675_v41, %v4166_v40  ;;  %v4731_v61 = vld [vmem:[#allocation10 + $0x3d4] sm:$0xf0] }
 0x1c4   : > { %v1897_v13 = vpop.f32.mrf.mxu3  ;;  %v1886_v18 = vpop.f32.mrf.mxu2  ;;  %v4283_v59 = vor.u32 %v4701_v47, %v4280_v51  ;;  %v4649_v62 = vld [vmem:[#allocation10 + $0x14c] sm:$0xf]  ;;  %v4294_v40 = vld [vmem:[#allocation10 + $0x308] sm:$0xf]  ;;  %v4707_v41 = vld [vmem:[#allocation10 + $0x314] sm:$0xf0] }
 0x1c5   : > { %v1898_v16 = vadd.f32 %v1897_v13, %v1885_v12  ;;  %v4687_v12 = vld [vmem:[#allocation10 + $0x274] sm:$0xf0]  ;;  %v4136_v13 = vld [vmem:[#allocation10 + $0x1d8] sm:$0xf0]  ;;  %v3947_v18 = vor.u32 %v4617_v29, %v3944_v14  ;;  %v4075_v6 = vor.u32 %v4649_v62, %v4072_v2  ;;  %v4693_v29 = vld [vmem:[#allocation10 + $0x2ac] sm:$0xf] }
 0x1c6   : > { %2853 = vmatpush.bf16.msra.mxu0 %v3927_v3  ;;  %2862 = vmatpush.bf16.msra.mxu1 %v4119_v4  ;;  %v4669_v3 = vld [vmem:[#allocation10 + $0x1ec] sm:$0xf]  ;;  %v4152_v4 = vld [vmem:[#allocation10 + $0x1f8] sm:$0xf0] }
 0x1c7   : > { %v1925_v17 = vpop.f32.mrf.mxu1  ;;  %v1955_v31 = vmul.f32 0.2, %v1898_v16  ;;  %v4155_v11 = vor.u32 %v4669_v3, %v4152_v4  ;;  %v4697_v3 = vld [vmem:[#allocation10 + $0x2cc] sm:$0xf]  ;;  %v4264_v4 = vld [vmem:[#allocation10 + $0x2d8] sm:$0xf0] }
 0x1c8   : > { %v4215_v17 = vor.u32 %v4687_v12, %v4214_v10  ;;  %v4727_v10 = vld [vmem:[#allocation10 + $0x3b4] sm:$0xf0]  ;;  %v4056_v12 = vld [vmem:[#allocation10 + $0x138] sm:$0xf0]  ;;  %v4729_v47 = vld [vmem:[#allocation10 + $0x3cc] sm:$0xf] }
 0x1c9   : > { %v1959_v32 = vmax.f32 %v1898_v16, %v1955_v31  ;;  %v3931_v31 = vor.u32 %v4613_v21, %v3928_v22  ;;  %v4248_v14 = vld [vmem:[#allocation10 + $0x2b8] sm:$0xf0]  ;;  %v4717_v62 = vld [vmem:[#allocation10 + $0x36c] sm:$0xf] }
 0x1ca   : > { %2854 = vmatpush.bf16.msra.mxu0 %v3911_v57  ;;  %2863 = vmatpush.bf16.msra.mxu1 %v4103_v19  ;;  %v4198_v57 = vld [vmem:[#allocation10 + $0x248] sm:$0xf]  ;;  %v4139_v19 = vor.u32 %v4665_v15, %v4136_v13  ;;  %v4251_v13 = vor.u32 %v4693_v29, %v4248_v14  ;;  %v4392_v51 = vld [vmem:[#allocation10 + $0x3d8] sm:$0xf0]  ;;  %v2093_v29 = vld [vmem:[#allocation11] sm:$0xf] }
 0x1cb   : > { %v5342_v39 = vpack.c.bf16 %v1959_v32, %v1959_v32  ;;  %v4199_v26 = vor.u32 %v4683_v20, %v4198_v57  ;;  %v4609_v32 = vld [vmem:[#allocation10 + $0xc] sm:$0xf]  ;;  %v4040_v57 = vld [vmem:[#allocation10 + $0x118] sm:$0xf0] }
 0x1cc   : > { %v1899_v37 = vpop.f32.mrf.mxu3 }
 0x1cd   : > { %2816 = vmatmul.bf16.vlgmr.msrb.gmra.mxu1 %v5333_v42  ;;  %2855 = vmatmul.bf16.vlgmr.msra.gmra.mxu0 %v5326_v0  ;;  %v4406_v37 = vld [vmem:[#allocation10 + $0x3e8] sm:$0xf] }
 0x1ce   : > { %2899 = vmatpush.bf16.msrb.mxu0 %v4027_v23  ;;  %2777 = vmatmul.bf16.vlgmr.msra.gmra.mxu2 %v5342_v39  ;;  %v4661_v23 = vld [vmem:[#allocation10 + $0x1ac] sm:$0xf] }
 0x1cf   : > { %2864 = vmatpush.bf16.msra.mxu1 %v4087_v33  ;;  %2873 = vmatpush.bf16.msra.mxu2 %v4279_v48  ;;  %v4123_v49 = vor.u32 %v4661_v23, %v4120_v24  ;;  %v3912_v33 = vld [vmem:[#allocation10 + $0x18] sm:$0xf0]  ;;  %v4342_v23 = vld [vmem:[#allocation10 + $0x368] sm:$0xf]  ;;  %v4719_v24 = vld [vmem:[#allocation10 + $0x374] sm:$0xf0] }
 0x1d0   : > { %v3915_v50 = vor.u32 %v4609_v32, %v3912_v33  ;;  %v4200_v32 = vld [vmem:[#allocation10 + $0x258] sm:$0xf0] }
 0x1d2   : > { %2900 = vmatpush.bf16.msrb.mxu0 %v4011_v34  ;;  %v4657_v34 = vld [vmem:[#allocation10 + $0x18c] sm:$0xf] }
 0x1d3   : > { %2865 = vmatpush.bf16.msra.mxu1 %v4071_v8  ;;  %2874 = vmatpush.bf16.msra.mxu2 %v4263_v54  ;;  %v4107_v54 = vor.u32 %v4657_v34, %v4104_v35  ;;  %v4310_v34 = vld [vmem:[#allocation10 + $0x328] sm:$0xf]  ;;  %v4711_v35 = vld [vmem:[#allocation10 + $0x334] sm:$0xf0] }
 0x1d6   : > { %2901 = vmatpush.bf16.msrb.mxu0 %v3995_v43  ;;  %v4735_v43 = vld [vmem:[#allocation10 + $0x3f4] sm:$0xf0] }
 0x1d7   : > { %2866 = vmatpush.bf16.msra.mxu1 %v4055_v55  ;;  %2875 = vmatpush.bf16.msra.mxu2 %v4247_v56  ;;  %v4407_v55 = vor.u32 %v4735_v43, %v4406_v37  ;;  %v4673_v37 = vld [vmem:[#allocation10 + $0x20c] sm:$0xf]  ;;  %v4408_v43 = vld [vmem:[#allocation10 + $0x3f8] sm:$0xf0] }
 0x1da   : > { %2902 = vmatpush.bf16.msrb.mxu0 %v3979_v58  ;;  %v4091_v58 = vor.u32 %v4653_v44, %v4088_v45  ;;  %v4295_v44 = vor.u32 %v4707_v41, %v4294_v40 }
 0x1db   : > { %2867 = vmatpush.bf16.msra.mxu1 %v4039_v5  ;;  %2876 = vmatpush.bf16.msra.mxu2 %v4231_v7  ;;  %v4391_v5 = vor.u32 %v4731_v61, %v4390_v60  ;;  %v4267_v7 = vor.u32 %v4697_v3, %v4264_v4  ;;  %v4360_v60 = vld [vmem:[#allocation10 + $0x398] sm:$0xf0]  ;;  %v4713_v3 = vld [vmem:[#allocation10 + $0x34c] sm:$0xf] }
 0x1dc   : > { %v4328_v4 = vld [vmem:[#allocation10 + $0x358] sm:$0xf0] }
 0x1dd   : > { %v1936_v16 = vpop.f32.mrf.mxu2 }
 0x1de   : > { %2903 = vmatpush.bf16.msrb.mxu0 %v3963_v9  ;;  %2868 = vmatmul.bf16.vlgmr.msra.gmra.mxu1 %v5333_v42  ;;  %v1937_v28 = vadd.f32 %v1936_v16, %v1924_v25  ;;  %v4374_v9 = vld [vmem:[#allocation10 + $0x3a8] sm:$0xf]  ;;  %v4685_v25 = vld [vmem:[#allocation10 + $0x26c] sm:$0xf] }
 0x1df   : > { %2912 = vmatpush.bf16.msrb.mxu1 %v4155_v11  ;;  %2829 = vmatmul.bf16.vlgmr.msrb.gmra.mxu2 %v5342_v39  ;;  %v4645_v11 = vld [vmem:[#allocation10 + $0x12c] sm:$0xf]  ;;  %v4375_v15 = vor.u32 %v4727_v10, %v4374_v9  ;;  %v4358_v16 = vld [vmem:[#allocation10 + $0x388] sm:$0xf] }
 0x1e0   : > { %2877 = vmatpush.bf16.msra.mxu2 %v4215_v17  ;;  %v4723_v17 = vld [vmem:[#allocation10 + $0x394] sm:$0xf0]  ;;  %v4705_v10 = vld [vmem:[#allocation10 + $0x30c] sm:$0xf] }
 0x1e1   : > { %v4359_v20 = vor.u32 %v4723_v17, %v4358_v16 }
 0x1e2   : > { %2904 = vmatpush.bf16.msrb.mxu0 %v3947_v18  ;;  %v4641_v18 = vld [vmem:[#allocation10 + $0x10c] sm:$0xf] }
 0x1e3   : > { %2913 = vmatpush.bf16.msrb.mxu1 %v4139_v19  ;;  %v4232_v19 = vld [vmem:[#allocation10 + $0x298] sm:$0xf0]  ;;  %v4043_v21 = vor.u32 %v4641_v18, %v4040_v57 }
 0x1e4   : > { %v1949_v48 = vpop.f32.mrf.mxu3  ;;  %2878 = vmatpush.bf16.msra.mxu2 %v4199_v26  ;;  %v4235_v22 = vor.u32 %v4689_v63, %v4232_v19  ;;  %v4216_v26 = vld [vmem:[#allocation10 + $0x278] sm:$0xf0]  ;;  %v2096_v63 = vperm.slane %v2093_v29, 1 }
 0x1e5   : > { %v1950_v36 = vadd.f32 %v1949_v48, %v1937_v28  ;;  %v1938_v38 = vpop.f32.mrf.mxu2  ;;  %v4219_v27 = vor.u32 %v4685_v25, %v4216_v26  ;;  %v4326_v28 = vld [vmem:[#allocation10 + $0x348] sm:$0xf]  ;;  %v4203_v48 = vor.u32 %v4681_v30, %v4200_v32 }
 0x1e6   : > { %2905 = vmatpush.bf16.msrb.mxu0 %v3931_v31  ;;  %v4343_v31 = vor.u32 %v4719_v24, %v4342_v23  ;;  %v4184_v38 = vld [vmem:[#allocation10 + $0x238] sm:$0xf0] }
 0x1e7   : > { %v1956_v8 = vmul.f32 0.2, %v1950_v36  ;;  %2914 = vmatpush.bf16.msrb.mxu1 %v4123_v49  ;;  %v4715_v49 = vld [vmem:[#allocation10 + $0x354] sm:$0xf0] }
 0x1e8   : > { %2879 = vmatpush.bf16.msra.mxu2 %v4183_v46  ;;  %v4327_v33 = vor.u32 %v4715_v49, %v4326_v28  ;;  %v4311_v46 = vor.u32 %v4711_v35, %v4310_v34 }
 0x1e9   : > { %v1960_v52 = vmax.f32 %v1950_v36, %v1956_v8  ;;  %v4677_v36 = vld [vmem:[#allocation10 + $0x22c] sm:$0xf]  ;;  %v4168_v8 = vld [vmem:[#allocation10 + $0x218] sm:$0xf0] }
 0x1ea   : > { %2906 = vmatpush.bf16.msrb.mxu0 %v3915_v50  ;;  %v4187_v50 = vor.u32 %v4677_v36, %v4184_v38 }
 0x1eb   : > { %v5352_v56 = vpack.c.bf16 %v1960_v52, %v1960_v52  ;;  %2915 = vmatpush.bf16.msrb.mxu1 %v4107_v54  ;;  %v4733_v54 = vld [vmem:[#allocation10 + $0x3ec] sm:$0xf]  ;;  %v4395_v52 = vor.u32 %v4729_v47, %v4392_v51 }
 0x1ec   : > { %v1951_v1 = vpop.f32.mrf.mxu3  ;;  %2880 = vmatpush.bf16.msra.mxu2 %v4167_v53  ;;  %v4411_v45 = vor.u32 %v4733_v54, %v4408_v43  ;;  %v4725_v53 = vld [vmem:[#allocation10 + $0x3ac] sm:$0xf] }
 0x1ed   : > { %2790 = vmatmul.bf16.vlgmr.msra.gmra.mxu3 %v5352_v56  ;;  %2907 = vmatmul.bf16.vlgmr.msrb.gmra.mxu0 %v5326_v0  ;;  %v4059_v0 = vor.u32 %v4645_v11, %v4056_v12  ;;  %v4344_v1 = vld [vmem:[#allocation10 + $0x378] sm:$0xf0] }
 0x1ee   : > { %2886 = vmatpush.bf16.msra.mxu3 %v4407_v55  ;;  %v4376_v55 = vld [vmem:[#allocation10 + $0x3b8] sm:$0xf0]  ;;  %v4347_v2 = vor.u32 %v4717_v62, %v4344_v1 }
 0x1ef   : > { %2916 = vmatpush.bf16.msrb.mxu1 %v4091_v58  ;;  %2881 = vmatmul.bf16.vlgmr.msra.gmra.mxu2 %v5342_v39  ;;  %v4379_v58 = vor.u32 %v4725_v53, %v4376_v55 }
 0x1f0   : > { %2925 = vmatpush.bf16.msrb.mxu2 %v4283_v59  ;;  %v4721_v59 = vld [vmem:[#allocation10 + $0x38c] sm:$0xf] }
 0x1f1   : > { %v4363_v61 = vor.u32 %v4721_v59, %v4360_v60 }
 0x1f2   : > { %2887 = vmatpush.bf16.msra.mxu3 %v4391_v5  ;;  %v4331_v5 = vor.u32 %v4713_v3, %v4328_v4 }
 0x1f3   : > { %2917 = vmatpush.bf16.msrb.mxu1 %v4075_v6  ;;  %v4709_v6 = vld [vmem:[#allocation10 + $0x32c] sm:$0xf] }
 0x1f4   : > { %2926 = vmatpush.bf16.msrb.mxu2 %v4267_v7  ;;  %v4312_v7 = vld [vmem:[#allocation10 + $0x338] sm:$0xf0] }
 0x1f5   : > { %v4315_v9 = vor.u32 %v4709_v6, %v4312_v7 }
 0x1f6   : > { %2888 = vmatpush.bf16.msra.mxu3 %v4375_v15  ;;  %v2095_v15 = vperm.slane %v2093_v29, 0 }
 0x1f7   : > { %2918 = vmatpush.bf16.msrb.mxu1 %v4059_v0 }
 0x1f8   : > { %2927 = vmatpush.bf16.msrb.mxu2 %v4251_v13 }
 0x1fa   : > { %2889 = vmatpush.bf16.msra.mxu3 %v4359_v20 }
 0x1fb   : > { %2919 = vmatpush.bf16.msrb.mxu1 %v4043_v21 }
 0x1fc   : > { %2928 = vmatpush.bf16.msrb.mxu2 %v4235_v22 }
 0x1fd   : > { %2842 = vmatmul.bf16.vlgmr.msrb.gmra.mxu3 %v5352_v56 }
 0x1fe   : > { %2890 = vmatpush.bf16.msra.mxu3 %v4343_v31  ;;  %2920 = vmatmul.bf16.vlgmr.msrb.gmra.mxu1 %v5333_v42  ;;  %v4171_v42 = vor.u32 %v4673_v37, %v4168_v8  ;;  %v2959_v8 = vld [vmem:[%s5390_s7] sm:$0xf] }
 0x1ff   : > { %v2962_v47 = vperm.slane %v2959_v8, 1  ;;  %v2963_v3 = vperm.slane %v2959_v8, 2 }
 0x200   : > { %2929 = vmatpush.bf16.msrb.mxu2 %v4219_v27 }
 0x202   : > { %2891 = vmatpush.bf16.msra.mxu3 %v4327_v33 }
 0x204   : > { %2930 = vmatpush.bf16.msrb.mxu2 %v4203_v48 }
 0x206   : > { %2892 = vmatpush.bf16.msra.mxu3 %v4311_v46 }
 0x208   : > { %2931 = vmatpush.bf16.msrb.mxu2 %v4187_v50 }
 0x20a   : > { %2893 = vmatpush.bf16.msra.mxu3 %v4295_v44 }
 0x20c   : > { %2932 = vmatpush.bf16.msrb.mxu2 %v4171_v42  ;;  %v2961_v42 = vperm.slane %v2959_v8, 0 }
 0x20d   : > { %2894 = vmatmul.bf16.vlgmr.msra.gmra.mxu3 %v5352_v56 }
 0x20e   : > { %2938 = vmatpush.bf16.msrb.mxu3 %v4411_v45 }
 0x20f   : > { %2933 = vmatmul.bf16.vlgmr.msrb.gmra.mxu2 %v5342_v39  ;;  %v4296_v39 = vld [vmem:[#allocation10 + $0x318] sm:$0xf0] }
 0x210   : > { %v4299_v11 = vor.u32 %v4705_v10, %v4296_v39  ;;  %v2098_v10 = vperm.slane %v2093_v29, 3 }
 0x212   : > { %2939 = vmatpush.bf16.msrb.mxu3 %v4395_v52 }
 0x216   : > { %2940 = vmatpush.bf16.msrb.mxu3 %v4379_v58 }
 0x21a   : > { %2941 = vmatpush.bf16.msrb.mxu3 %v4363_v61 }
 0x21e   : > { %2942 = vmatpush.bf16.msrb.mxu3 %v4347_v2 }
 0x222   : > { %2943 = vmatpush.bf16.msrb.mxu3 %v4331_v5 }
 0x226   : > { %2944 = vmatpush.bf16.msrb.mxu3 %v4315_v9 }
 0x22a   : > { %2945 = vmatpush.bf16.msrb.mxu3 %v4299_v11  ;;  %v2752_v12 = vpop.f32.mrf.mxu0 }
 0x22b   : > { %v2753_v0 = vadd.f32 %v2752_v12, %v2095_v15 }
 0x22d   : > { %2946 = vmatmul.bf16.vlgmr.msrb.gmra.mxu3 %v5352_v56  ;;  %v2097_v56 = vperm.slane %v2093_v29, 2 }
 0x232   : > { %v2754_v14 = vpop.f32.mrf.mxu0 }
 0x23a   : > { %v2765_v13 = vpop.f32.mrf.mxu1  ;;  %v2804_v16 = vpop.f32.mrf.mxu0 }
 0x23b   : > { %v2766_v17 = vadd.f32 %v2765_v13, %v2753_v0  ;;  %v2805_v19 = vadd.f32 %v2804_v16, %v2096_v63  ;;  %v2964_v13 = vperm.slane %v2959_v8, 3  ;;  %v4823_v63 = vld [vmem:[#allocation2] ss:$0 sm:$0xff] }
 0x242   : > { %v2767_v18 = vpop.f32.mrf.mxu1  ;;  %v2806_v57 = vpop.f32.mrf.mxu0 }
 0x24a   : > { %v2817_v20 = vpop.f32.mrf.mxu1  ;;  %v2856_v21 = vpop.f32.mrf.mxu0 }
 0x24b   : > { %v2818_v22 = vadd.f32 %v2817_v20, %v2805_v19  ;;  %v2857_v31 = vadd.f32 %v2856_v21, %v2097_v56 }
 0x251   : > { %v2778_v23 = vpop.f32.mrf.mxu2 }
 0x252   : > { %v2779_v24 = vadd.f32 %v2778_v23, %v2766_v17  ;;  %v2819_v25 = vpop.f32.mrf.mxu1  ;;  %v2858_v26 = vpop.f32.mrf.mxu0 }
 0x259   : > { %v2780_v27 = vpop.f32.mrf.mxu2 }
 0x25b   : > { %v2869_v28 = vpop.f32.mrf.mxu1 }
 0x25c   : > { %v2870_v49 = vadd.f32 %v2869_v28, %v2857_v31 }
 0x262   : > { %v2830_v30 = vpop.f32.mrf.mxu2 }
 0x263   : > { %v2831_v32 = vadd.f32 %v2830_v30, %v2818_v22  ;;  %v2871_v33 = vpop.f32.mrf.mxu1 }
 0x26a   : > { %v2908_v48 = vpop.f32.mrf.mxu0  ;;  %v2832_v34 = vpop.f32.mrf.mxu2 }
 0x26b   : > { %v2909_v39 = vadd.f32 %v2908_v48, %v2098_v10 }
 0x270   : > { %v2791_v35 = vpop.f32.mrf.mxu3 }
 0x271   : > { %v2792_v50 = vadd.f32 %v2791_v35, %v2779_v24 }
 0x272   : > { %v2910_v36 = vpop.f32.mrf.mxu0  ;;  %v2882_v38 = vpop.f32.mrf.mxu2 }
 0x273   : > { %v2951_v37 = vmul.f32 0.2, %v2792_v50  ;;  %v2883_v60 = vadd.f32 %v2882_v38, %v2870_v49 }
 0x275   : > { %v2955_v44 = vmax.f32 %v2792_v50, %v2951_v37 }
 0x277   : > { %v2969_v53 = vmul.f32 %v2961_v42, %v2955_v44 }
 0x278   : > { %v2793_v46 = vpop.f32.mrf.mxu3 }
 0x27a   : > { %v2884_v41 = vpop.f32.mrf.mxu2 }
 0x27b   : > { %v2921_v40 = vpop.f32.mrf.mxu1 }
 0x27c   : > { %v2922_v11 = vadd.f32 %v2921_v40, %v2909_v39 }
 0x280   : > { %v2843_v54 = vpop.f32.mrf.mxu3 }
 0x281   : > { %v2844_v43 = vadd.f32 %v2843_v54, %v2831_v32 }
 0x283   : > { %v2952_v45 = vmul.f32 0.2, %v2844_v43  ;;  %v2923_v51 = vpop.f32.mrf.mxu1 }
 0x285   : > { %v2956_v52 = vmax.f32 %v2844_v43, %v2952_v45 }
 0x287   : > { %v2970_v55 = vmul.f32 %v2962_v47, %v2956_v52 }
 0x288   : > { %v2845_v58 = vpop.f32.mrf.mxu3 }
 0x289   : > { %v2973_v59 = vadd.f32 %v2970_v55, %v2969_v53 }
 0x290   : > { %v2895_v61 = vpop.f32.mrf.mxu3 }
 0x291   : > { %v2896_v62 = vadd.f32 %v2895_v61, %v2883_v60 }
 0x292   : > { %v2934_v1 = vpop.f32.mrf.mxu2 }
 0x293   : > { %v2953_v2 = vmul.f32 0.2, %v2896_v62  ;;  %v2935_v12 = vadd.f32 %v2934_v1, %v2922_v11 }
 0x295   : > { %v2957_v4 = vmax.f32 %v2896_v62, %v2953_v2 }
 0x297   : > { %v2971_v5 = vmul.f32 %v2963_v3, %v2957_v4 }
 0x298   : > { %v2897_v6 = vpop.f32.mrf.mxu3 }
 0x299   : > { %v2974_v9 = vadd.f32 %v2973_v59, %v2971_v5 }
 0x29a   : > { %v2936_v7 = vpop.f32.mrf.mxu2 }
 0x2b0   : > { %v2947_v14 = vpop.f32.mrf.mxu3 }
 0x2b1   : > { %v2948_v15 = vadd.f32 %v2947_v14, %v2935_v12 }
 0x2b3   : > { %v2954_v0 = vmul.f32 0.2, %v2948_v15 }
 0x2b5   : > { %v2958_v16 = vmax.f32 %v2948_v15, %v2954_v0 }
 0x2b7   : > { %v2972_v17 = vmul.f32 %v2964_v13, %v2958_v16 }
 0x2b8   : > { %v2949_v18 = vpop.f32.mrf.mxu3 }
 0x2b9   : > { %v2975_v57 = vadd.f32 %v2974_v9, %v2972_v17 }
 0x2bb   : > { %2976 = vadd.xlane.f32.xlu0 %v2975_v57 }
 0x32e   : > { %v2977_v29 = vpop.xlane.xlu0 %2976 }
 0x32f   : > { %v2982_v19 = vadd.f32 %v4823_v63, %v2977_v29 }
 0x331   : > { %2984 = vst.msk [vmem:[%s456_s21] sm:$0xff] %vm2983_vm0, %v2982_v19 }
 0x332 PF: > { %p26_p3 = scmp.ge.s32.totalorder %s5174_s23, 4   ;;  %s5403_s11 = smov %s5046_s12 }
 0x333   : > { %s5404_s12 = smov %s5050_s13  ;;  %s5405_s13 = smov %s5186_s27 }
 0x334   : > { %s5406_s14 = smov %s5174_s23  ;;  %28 = sbr.rel (!%p26_p3) target bundleno = 11 (0xb), region = 125 }
 0x339   :  { %3004 = vsyncpa [#allocation4], 1 }
 0x33a   :  { %3006 = vsyncpa [#allocation4 + $0x1], 1 }
 0x33b   :  { %3007 = vsyncpa [#allocation6], 1 }
 0x33c   :  { %3009 = vsyncpa [#allocation6 + $0x1], 1 }
 0x33d   :  { %3010 = vsyncpa [#allocation9], 1 }
 0x33e   :  { %3011 = vsyncpa [#allocation12], 1 }

</bundles_post_ra>
